<compile_context>
chip_gen: v5e
topology: v5e:2x2
jax: 0.10.0
libtpu: 0.0.40
codegen_flags: <defaults>
</compile_context>

<pallas_src>
import functools
import math

import jax
import jax.numpy as jnp
from jax.experimental import pallas as pl
from jax.experimental.pallas import tpu as pltpu


_PI_APPROX = 3.14159265  # same constant the PyTorch module uses


def _chebyshev_cos_m_theta(c, m):
    """mlambda[m](cos_theta) from the PyTorch module (m is a static int)."""
    if m == 0:
        return jnp.ones_like(c)
    if m == 1:
        return c
    if m == 2:
        return 2.0 * c * c - 1.0
    if m == 3:
        return (4.0 * c * c - 3.0) * c
    if m == 4:
        c2 = c * c
        return (8.0 * c2 - 8.0) * c2 + 1.0
    c2 = c * c  # m == 5
    return ((16.0 * c2 - 20.0) * c2 + 5.0) * c


def _sphere_product_kernel(x_ref, wt_ref, label_ref, lamb_ref, out_ref, *,
                           m, tn, mxu_dtype):
    """One (batch tile, class tile) block of the SphereProduct forward.

    x_ref     : (tm, Fp) f32   input rows (zero padded on both axes)
    wt_ref    : (Fp, tn) f32   class-weight columns for this class tile
    label_ref : (tm, 1)  i32   global class labels (-1 for padded rows)
    lamb_ref  : (1, 1)   f32   current lambda (SMEM scalar)
    out_ref   : (tm, tn) f32   output logits tile
    """
    col0 = pl.program_id(1) * tn

    # Row-normalized input (f32) + raw L2 norm needed for the final scale.
    x = x_ref[...]                                              # (tm, Fp)
    norm_x = jnp.sqrt(jnp.sum(x * x, axis=-1, keepdims=True))   # (tm, 1)
    x_hat = x * (1.0 / jnp.maximum(norm_x, 1e-12))

    # Column-normalized class weights for this tile (per-class norm is
    # column-local, so tiling the class dim keeps it exact).
    w = wt_ref[...]                                             # (Fp, tn)
    norm_w = jnp.sqrt(jnp.sum(w * w, axis=0, keepdims=True))    # (1, tn)
    w_hat = w * (1.0 / jnp.maximum(norm_w, 1e-12))

    # cos(theta): low-precision MXU feed, f32 accumulation.
    cos_theta = jnp.dot(x_hat.astype(mxu_dtype), w_hat.astype(mxu_dtype),
                        preferred_element_type=jnp.float32)
    cos_theta = jnp.clip(cos_theta, -1.0, 1.0)

    # cos(m*theta) via the Chebyshev polynomial.
    cos_m_theta = _chebyshev_cos_m_theta(cos_theta, m)

    # k = floor(m*acos(cos)/pi) without acos: acos is monotone decreasing, so k
    # equals the number of thresholds cos(j*pi/m), j=1..m, that cos_theta is <=.
    k = jnp.zeros_like(cos_theta)
    for j in range(1, m + 1):
        thr = math.cos(j * _PI_APPROX / m)
        k = k + (cos_theta <= thr).astype(jnp.float32)

    sign = 1.0 - 2.0 * (k - 2.0 * jnp.floor(0.5 * k))           # (-1)^k
    phi_theta = sign * cos_m_theta - 2.0 * k

    # Per-tile one-hot selection against global class ids.
    labels = label_ref[...]                                     # (tm, 1) int32
    class_ids = jax.lax.broadcasted_iota(jnp.int32, cos_theta.shape, 1) + col0
    is_target = class_ids == labels

    inv_1p_lamb = 1.0 / (1.0 + lamb_ref[0, 0])
    logits = jnp.where(is_target,
                       (phi_theta - cos_theta) * inv_1p_lamb + cos_theta,
                       cos_theta)
    out_ref[...] = (logits * norm_x).astype(out_ref.dtype)


def _round_up(a, b):
    return (a + b - 1) // b * b


def sphere_product_forward(x, label, weight, *, m=4, iteration=1,
                           base=1000.0, gamma=0.12, power=1, lambda_min=5.0,
                           mxu_dtype=jnp.bfloat16, tn=None):
    """SphereProduct.forward.

    x      : (B, in_features) f32
    label  : (B,)             int
    weight : (out_features, in_features) f32
    Returns (B, out_features) f32 logits.
    """
    assert 0 <= m <= 5, "SphereProduct supports m in [0, 5]"
    B, F = x.shape
    C, F2 = weight.shape
    assert F2 == F

    # Host-side state update (self.iter / self.lamb in the PyTorch module).
    lamb = max(lambda_min, base * (1.0 + gamma * iteration) ** (-power))

    # ---- tile / padding choices ---------------------------------------------
    Fp = _round_up(F, 128)                     # feature dim, lane-aligned
    tm = min(128, _round_up(B, 8))             # batch tile (MXU M dim)
    pB = _round_up(B, tm)

    if tn is None:
        # Largest class tile (multiple of 128, <= 512) whose double-buffered
        # working set stays under ~20 MiB (safe on v7x's 32 MiB scoped default).
        budget = 20 * 1024 * 1024
        tn = 512
        while tn > 128 and 2 * 4 * (tm * Fp + Fp * tn + tm * tn + tm) > budget:
            tn -= 128
    pC = _round_up(max(C, tn), tn)             # class dim, lane-dense tiles

    f32 = jnp.float32
    xp = jnp.zeros((pB, Fp), f32).at[:B, :F].set(x.astype(f32))
    wtp = jnp.zeros((Fp, pC), f32).at[:F, :C].set(weight.astype(f32).T)
    labp = jnp.full((pB, 1), -1, jnp.int32).at[:B, 0].set(label.astype(jnp.int32))
    lamb_arr = jnp.array([[lamb]], dtype=f32)  # SMEM scalar (no recompile per iter)

    grid = (pB // tm, pC // tn)

    kernel = functools.partial(_sphere_product_kernel, m=m, tn=tn,
                               mxu_dtype=mxu_dtype)

    flops = 2 * pB * Fp * pC + 16 * pB * pC
    bytes_accessed = 4 * (pB * Fp * grid[1] + Fp * pC * grid[0] + pB * pC + 2 * pB)

    out = pl.pallas_call(
        kernel,
        out_shape=jax.ShapeDtypeStruct((pB, pC), f32),
        grid_spec=pltpu.PrefetchScalarGridSpec(
            num_scalar_prefetch=0,
            grid=grid,
            in_specs=[
                pl.BlockSpec((tm, Fp), lambda i, j: (i, 0)),    # x rows
                pl.BlockSpec((Fp, tn), lambda i, j: (0, j)),    # weight^T cols
                pl.BlockSpec((tm, 1), lambda i, j: (i, 0)),     # labels
                pl.BlockSpec(memory_space=pltpu.MemorySpace.SMEM),  # lamb scalar
            ],
            out_specs=pl.BlockSpec((tm, tn), lambda i, j: (i, j)),
        ),
        compiler_params=pltpu.CompilerParams(
            dimension_semantics=("parallel", "parallel"),
            vmem_limit_bytes=48 * 1024 * 1024,
        ),
        cost_estimate=pl.CostEstimate(
            flops=flops,
            transcendentals=pB + pC,
            bytes_accessed=bytes_accessed,
        ),
    )(xp, wtp, labp, lamb_arr)

    return out[:B, :C]


def _sphere_product_reference(x, label, weight, *, m=4, iteration=1,
                              base=1000.0, gamma=0.12, power=1, lambda_min=5.0):
    """Pure-JAX mirror of the PyTorch forward (for correctness checking)."""
    lamb = max(lambda_min, base * (1.0 + gamma * iteration) ** (-power))
    x = x.astype(jnp.float32)
    w = weight.astype(jnp.float32)
    xn = x / jnp.maximum(jnp.linalg.norm(x, axis=1, keepdims=True), 1e-12)
    wn = w / jnp.maximum(jnp.linalg.norm(w, axis=1, keepdims=True), 1e-12)
    cos = jnp.clip(xn @ wn.T, -1.0, 1.0)
    cos_m = _chebyshev_cos_m_theta(cos, m)
    theta = jnp.arccos(cos)
    k = jnp.floor(m * theta / _PI_APPROX)
    sign = jnp.where(jnp.mod(k, 2.0) == 0.0, 1.0, -1.0)
    phi = sign * cos_m - 2.0 * k
    norm = jnp.linalg.norm(x, axis=1, keepdims=True)
    one_hot = jax.nn.one_hot(label, weight.shape[0], dtype=jnp.float32)
    out = one_hot * (phi - cos) / (1.0 + lamb) + cos
    return out * norm


if __name__ == "__main__":
    B, IN_FEATURES, OUT_FEATURES, M = 32, 256, 1024, 4

    key = jax.random.PRNGKey(0)
    kx, kl, kw = jax.random.split(key, 3)

    x = jax.random.normal(kx, (B, IN_FEATURES), dtype=jnp.float32)
    label = jax.random.randint(kl, (B,), 0, OUT_FEATURES, dtype=jnp.int32)
    # xavier_uniform-style init for the class weights
    limit = math.sqrt(6.0 / (IN_FEATURES + OUT_FEATURES))
    weight = jax.random.uniform(kw, (OUT_FEATURES, IN_FEATURES),
                                dtype=jnp.float32, minval=-limit, maxval=limit)

    # Performance configuration (bf16 MXU feeds, f32 elementwise).
    out = sphere_product_forward(x, label, weight, m=M, iteration=1)
    jax.block_until_ready(out)
    assert out.shape == (B, OUT_FEATURES)
    assert bool(jnp.all(jnp.isfinite(out)))

    # Tight numerical check (f32 MXU feeds) against the pure-JAX reference.
    out_f32 = sphere_product_forward(x, label, weight, m=M, iteration=1,
                                     mxu_dtype=jnp.float32)
    ref = _sphere_product_reference(x, label, weight, m=M, iteration=1)
    jax.block_until_ready((out_f32, ref))
    assert jnp.allclose(out_f32, ref, atol=2e-3, rtol=2e-3), "mismatch vs reference"

    # TODO(synk): self.iter / self.lamb annealing is host-side Python state; it is
    # computed in the wrapper (pass `iteration=`) and fed to the kernel via SMEM.
    print("KERNEL_OK")
</pallas_src>

<mosaic_0001>
module attributes {stable_mosaic.version = 11 : i64} {
  func.func @_sphere_product_kernel(%arg0: i32, %arg1: i32, %arg2: memref<32x256xf32, #tpu.memory_space<vmem>>, %arg3: memref<256x512xf32, #tpu.memory_space<vmem>>, %arg4: memref<32x1xi32, #tpu.memory_space<vmem>>, %arg5: memref<1x1xf32, #tpu.memory_space<smem>>, %arg6: memref<32x512xf32, #tpu.memory_space<vmem>>) attributes {dimension_semantics = [#tpu.dimension_semantics<parallel>, #tpu.dimension_semantics<parallel>], iteration_bounds = array<i64: 1, 2>, scalar_prefetch = 0 : i64, scratch_operands = 0 : i64, tpu.core_type = #tpu.core_type<tc>, window_params = [{transform_indices = @transform_0, window_bounds = array<i64: 32, 256>}, {transform_indices = @transform_1, window_bounds = array<i64: 256, 512>}, {transform_indices = @transform_2, window_bounds = array<i64: 32, 1>}, {transform_indices = @transform_3, window_bounds = array<i64: 1, 1>}, {transform_indices = @transform_4, window_bounds = array<i64: 32, 512>}]} {
    %c512_i32 = arith.constant 512 : i32
    %0 = arith.muli %arg1, %c512_i32 : i32
    %c0 = arith.constant 0 : index
    %c0_0 = arith.constant 0 : index
    %1 = vector.load %arg2[%c0, %c0_0] : memref<32x256xf32, #tpu.memory_space<vmem>>, vector<32x256xf32>
    %2 = arith.mulf %1, %1 : vector<32x256xf32>
    %cst = arith.constant dense<0.000000e+00> : vector<32xf32>
    %3 = vector.multi_reduction <add>, %2, %cst [1] : vector<32x256xf32> to vector<32xf32>
    %4 = vector.shape_cast %3 : vector<32xf32> to vector<32x1xf32>
    %5 = math.sqrt %4 : vector<32x1xf32>
    %cst_1 = arith.constant 9.99999996E-13 : f32
    %6 = vector.broadcast %cst_1 : f32 to vector<32x1xf32>
    %7 = arith.maximumf %5, %6 : vector<32x1xf32>
    %cst_2 = arith.constant 1.000000e+00 : f32
    %8 = vector.broadcast %cst_2 : f32 to vector<32x1xf32>
    %9 = arith.divf %8, %7 : vector<32x1xf32>
    %10 = vector.broadcast %9 : vector<32x1xf32> to vector<32x256xf32>
    %11 = arith.mulf %1, %10 : vector<32x256xf32>
    %c0_3 = arith.constant 0 : index
    %c0_4 = arith.constant 0 : index
    %12 = vector.load %arg3[%c0_3, %c0_4] : memref<256x512xf32, #tpu.memory_space<vmem>>, vector<256x512xf32>
    %13 = arith.mulf %12, %12 : vector<256x512xf32>
    %cst_5 = arith.constant dense<0.000000e+00> : vector<512xf32>
    %14 = vector.multi_reduction <add>, %13, %cst_5 [0] : vector<256x512xf32> to vector<512xf32>
    %15 = vector.shape_cast %14 : vector<512xf32> to vector<1x512xf32>
    %16 = math.sqrt %15 : vector<1x512xf32>
    %cst_6 = arith.constant 9.99999996E-13 : f32
    %17 = vector.broadcast %cst_6 : f32 to vector<1x512xf32>
    %18 = arith.maximumf %16, %17 : vector<1x512xf32>
    %cst_7 = arith.constant 1.000000e+00 : f32
    %19 = vector.broadcast %cst_7 : f32 to vector<1x512xf32>
    %20 = arith.divf %19, %18 : vector<1x512xf32>
    %21 = vector.broadcast %20 : vector<1x512xf32> to vector<256x512xf32>
    %22 = arith.mulf %12, %21 : vector<256x512xf32>
    %23 = arith.truncf %11 : vector<32x256xf32> to vector<32x256xbf16>
    %24 = arith.truncf %22 : vector<256x512xf32> to vector<256x512xbf16>
    %cst_8 = arith.constant dense<0.000000e+00> : vector<32x512xf32>
    %25 = tpu.matmul %23, %24, %cst_8 {dimension_numbers = #tpu.dot_dimension_numbers<[1], [0], [0], [1], [0, 0, 1, 1], [], []>} : vector<32x256xbf16>, vector<256x512xbf16>, vector<32x512xf32> -> vector<32x512xf32>
    %cst_9 = arith.constant -1.000000e+00 : f32
    %cst_10 = arith.constant 1.000000e+00 : f32
    %26 = vector.broadcast %cst_9 : f32 to vector<32x512xf32>
    %27 = arith.maximumf %26, %25 : vector<32x512xf32>
    %28 = vector.broadcast %cst_10 : f32 to vector<32x512xf32>
    %29 = arith.minimumf %28, %27 : vector<32x512xf32>
    %30 = arith.mulf %29, %29 : vector<32x512xf32>
    %cst_11 = arith.constant 8.000000e+00 : f32
    %31 = vector.broadcast %cst_11 : f32 to vector<32x512xf32>
    %32 = arith.mulf %31, %30 : vector<32x512xf32>
    %cst_12 = arith.constant 8.000000e+00 : f32
    %33 = vector.broadcast %cst_12 : f32 to vector<32x512xf32>
    %34 = arith.subf %32, %33 : vector<32x512xf32>
    %35 = arith.mulf %34, %30 : vector<32x512xf32>
    %cst_13 = arith.constant 1.000000e+00 : f32
    %36 = vector.broadcast %cst_13 : f32 to vector<32x512xf32>
    %37 = arith.addf %35, %36 : vector<32x512xf32>
    %cst_14 = arith.constant 0.000000e+00 : f32
    %38 = vector.broadcast %cst_14 : f32 to vector<32x512xf32>
    %cst_15 = arith.constant 0.707106769 : f32
    %39 = vector.broadcast %cst_15 : f32 to vector<32x512xf32>
    %40 = arith.cmpf ole, %29, %39 : vector<32x512xf32>
    %41 = arith.extui %40 : vector<32x512xi1> to vector<32x512xi32>
    %42 = arith.sitofp %41 : vector<32x512xi32> to vector<32x512xf32>
    %43 = arith.addf %38, %42 : vector<32x512xf32>
    %cst_16 = arith.constant 1.79489656E-9 : f32
    %44 = vector.broadcast %cst_16 : f32 to vector<32x512xf32>
    %45 = arith.cmpf ole, %29, %44 : vector<32x512xf32>
    %46 = arith.extui %45 : vector<32x512xi1> to vector<32x512xi32>
    %47 = arith.sitofp %46 : vector<32x512xi32> to vector<32x512xf32>
    %48 = arith.addf %43, %47 : vector<32x512xf32>
    %cst_17 = arith.constant -0.707106769 : f32
    %49 = vector.broadcast %cst_17 : f32 to vector<32x512xf32>
    %50 = arith.cmpf ole, %29, %49 : vector<32x512xf32>
    %51 = arith.extui %50 : vector<32x512xi1> to vector<32x512xi32>
    %52 = arith.sitofp %51 : vector<32x512xi32> to vector<32x512xf32>
    %53 = arith.addf %48, %52 : vector<32x512xf32>
    %cst_18 = arith.constant -1.000000e+00 : f32
    %54 = vector.broadcast %cst_18 : f32 to vector<32x512xf32>
    %55 = arith.cmpf ole, %29, %54 : vector<32x512xf32>
    %56 = arith.extui %55 : vector<32x512xi1> to vector<32x512xi32>
    %57 = arith.sitofp %56 : vector<32x512xi32> to vector<32x512xf32>
    %58 = arith.addf %53, %57 : vector<32x512xf32>
    %cst_19 = arith.constant 5.000000e-01 : f32
    %59 = vector.broadcast %cst_19 : f32 to vector<32x512xf32>
    %60 = arith.mulf %59, %58 : vector<32x512xf32>
    %61 = math.floor %60 : vector<32x512xf32>
    %cst_20 = arith.constant 2.000000e+00 : f32
    %62 = vector.broadcast %cst_20 : f32 to vector<32x512xf32>
    %63 = arith.mulf %62, %61 : vector<32x512xf32>
    %64 = arith.subf %58, %63 : vector<32x512xf32>
    %cst_21 = arith.constant 2.000000e+00 : f32
    %65 = vector.broadcast %cst_21 : f32 to vector<32x512xf32>
    %66 = arith.mulf %65, %64 : vector<32x512xf32>
    %cst_22 = arith.constant 1.000000e+00 : f32
    %67 = vector.broadcast %cst_22 : f32 to vector<32x512xf32>
    %68 = arith.subf %67, %66 : vector<32x512xf32>
    %69 = arith.mulf %68, %37 : vector<32x512xf32>
    %cst_23 = arith.constant 2.000000e+00 : f32
    %70 = vector.broadcast %cst_23 : f32 to vector<32x512xf32>
    %71 = arith.mulf %70, %58 : vector<32x512xf32>
    %72 = arith.subf %69, %71 : vector<32x512xf32>
    %c0_24 = arith.constant 0 : index
    %c0_25 = arith.constant 0 : index
    %73 = vector.load %arg4[%c0_24, %c0_25] : memref<32x1xi32, #tpu.memory_space<vmem>>, vector<32x1xi32>
    %74 = tpu.iota {dimensions = array<i32: 1>} : vector<32x512xi32>
    %75 = vector.broadcast %0 : i32 to vector<32x512xi32>
    %76 = arith.addi %74, %75 : vector<32x512xi32>
    %77 = vector.broadcast %73 : vector<32x1xi32> to vector<32x512xi32>
    %78 = arith.cmpi eq, %76, %77 : vector<32x512xi32>
    %c0_26 = arith.constant 0 : index
    %c0_27 = arith.constant 0 : index
    %79 = memref.load %arg5[%c0_26, %c0_27] : memref<1x1xf32, #tpu.memory_space<smem>>
    %cst_28 = arith.constant 1.000000e+00 : f32
    %80 = arith.addf %cst_28, %79 : f32
    %cst_29 = arith.constant 1.000000e+00 : f32
    %81 = arith.divf %cst_29, %80 : f32
    %82 = arith.subf %72, %29 : vector<32x512xf32>
    %83 = vector.broadcast %81 : f32 to vector<32x512xf32>
    %84 = arith.mulf %82, %83 : vector<32x512xf32>
    %85 = arith.addf %84, %29 : vector<32x512xf32>
    %86 = arith.select %78, %85, %29 : vector<32x512xi1>, vector<32x512xf32>
    %87 = vector.broadcast %5 : vector<32x1xf32> to vector<32x512xf32>
    %88 = arith.mulf %86, %87 : vector<32x512xf32>
    %c0_30 = arith.constant 0 : index
    %c0_31 = arith.constant 0 : index
    %89 = vector.load %arg6[%c0_30, %c0_31] : memref<32x512xf32, #tpu.memory_space<vmem>>, vector<32x512xf32>
    tpu.vector_store %arg6[%c0_30, %c0_31], %88 {strides = array<i32>} : memref<32x512xf32, #tpu.memory_space<vmem>>, vector<32x512xf32>,
    return
  }
  func.func @transform_0(%arg0: i32, %arg1: i32) -> (i32, i32) {
    %c0_i32 = arith.constant 0 : i32
    %c0_i32_0 = arith.constant 0 : i32
    return %arg0, %c0_i32 : i32, i32
  }
  func.func @transform_1(%arg0: i32, %arg1: i32) -> (i32, i32) {
    %c0_i32 = arith.constant 0 : i32
    %c0_i32_0 = arith.constant 0 : i32
    return %c0_i32, %arg1 : i32, i32
  }
  func.func @transform_2(%arg0: i32, %arg1: i32) -> (i32, i32) {
    %c0_i32 = arith.constant 0 : i32
    %c0_i32_0 = arith.constant 0 : i32
    return %arg0, %c0_i32 : i32, i32
  }
  func.func @transform_3(%arg0: i32, %arg1: i32) -> (i32, i32) {
    %c0_i32 = arith.constant 0 : i32
    %c0_i32_0 = arith.constant 0 : i32
    %c0_i32_1 = arith.constant 0 : i32
    return %c0_i32, %c0_i32_0 : i32, i32
  }
  func.func @transform_4(%arg0: i32, %arg1: i32) -> (i32, i32) {
    %c0_i32 = arith.constant 0 : i32
    return %arg0, %arg1 : i32, i32
  }
}

</mosaic_0001>

<bundles_post_ra>
// kernel: tpu_custom_call.1
= control target key start
LH: loop header
LB: loop body
LE: loop exit
PB: predicated region body
PF: predicated region fallthrough
CT: control target
= control target key end

     0   :  { %s4020_s0 = inlined_call_operand.hbm [shape: f32[32,256], index: 0, kind: input, shape index: {}]   ;;  %s4021_s1 = inlined_call_operand.hbm [shape: f32[256,1024], index: 1, kind: input, shape index: {}]   ;;  %s4022_s2 = inlined_call_operand.vmem [shape: s32[32,1], index: 2, kind: input, shape index: {}]   ;;  %s4023_s3 = inlined_call_operand.<no memory space> [shape: f32[1,1], index: 3, kind: input, shape index: {}]   ;;  %s4024_s4 = inlined_call_operand.hbm [shape: f32[32,1024], index: 4, kind: output, shape index: {}]  }
   0x1   :  { %4043 = sst [smem:[#allocation30_spill]] %s4020_s0 }
   0x2   :  { %9 = sst [smem:[#allocation2]] %s4023_s3 }
   0x3   :  { %10 = vsyncpa [#allocation4], 0 }
   0x4   :  { %11 = vsyncpa [#allocation7], 0 }
   0x5   :  { %13 = vsyncpa [#allocation7 + $0x1], 0 }
   0x6   :  { %14 = vsyncpa [#allocation5], 0 }
   0x7   :  { %16 = vsyncpa [#allocation5 + $0x1], 0  ;;  %s2603_s17 = smov 0   ;;  %s2605_s18 = smov 0  }
   0x8   :  { %s2607_s19 = smov 0   ;;  %s2609_s20 = smov 0  }
   0x9   :  { %s2611_s21 = smov 0   ;;  %s2613_s22 = smov 0  }
   0xa LB: > { %s2099_s3 = sadd.s32 4294967295, %s2562_s22   ;;  %s2100_s23 = sadd.s32 4294967294, %s2562_s22   ;;  %s2562_s22 = sphi %s2613_s22, %s22_s22   ;;  %s2558_s21 = sphi %s2611_s21, %s4094_s21   ;;  %s2554_s20 = sphi %s2609_s20, %s4093_s20   ;;  %s2550_s19 = sphi %s2607_s19, %s4092_s19   ;;  %s2546_s18 = sphi %s2605_s18, %s4091_s18   ;;  %s2542_s17 = sphi %s2603_s17, %s4090_s17  }
   0xb   : > { %p80_p0 = scmp.ne.s32.totalorder %s2546_s18, %s2542_s17  ;;  %p2637_p1 = scmp.eq.s32.totalorder %s2099_s3, 0 }
   0xc   : > { %p2641_p2 = scmp.eq.s32.totalorder %s2099_s3, 1  ;;  %p159_p3 = scmp.eq.s32.totalorder %s2100_s23, 1 }
   0xd   : > { %p2647_p4 = por %p2637_p1, %p80_p0  ;;  %p2101_p5 = scmp.ge.s32.totalorder %s2562_s22, 1 }
   0xe   : > { %p2652_p6 = por %p159_p3, %p80_p0  ;;  %p166_p7 = scmp.lt.s32.totalorder %s2562_s22, 3 }
   0xf   : > { %s4048_s0 = sld [smem:[#allocation30_spill]]  ;;  %s2564_s6 = smov [#allocation3]  }
  0x10   : > { %p2660_p8 = pnand %p2101_p5, %p166_p7  ;;  %s183_s7 = sshll.u32 %s2564_s6, 4  ;;  %s184_s7 = int_to_ptr.vmem [resolvable:$true] %s183_s7 }
  0x11   : > { %p2104_p11 = scmp.ge.s32.totalorder %s2562_s22, 2  ;;  %s2565_s8 = smov 256  }
  0x12   : > { %p2226_p9 = pneg %p2660_p8  ;;  %s2566_s9 = smov 16  }
  0x13   : > { %s31_s10 = sadd.s32 1, %s2558_s21  ;;  %s67_s11 = sadd.s32 1, %s2550_s19 }
  0x14   : > { %p2227_p10 = pnand %p2226_p9, %p2637_p1  ;;  %p32_p12 = scmp.ge.s32.totalorder %s31_s10, 2 }
  0x15   : > { %s181_s30 = sshll.u32 %s4048_s0, 4  ;;  %p74_p13 = scmp.ne.s32.totalorder %s2550_s19, %s2546_s18  ;;  %s182_s30 = int_to_ptr.hbm [resolvable:$true] %s181_s30 }
  0x16   : > { %2229 = dma.hbm_to_vmem [thread:$0]  (!%p2227_p10), %s182_s30, 1024, %s184_s7, [#allocation4], %s2565_s8, %s2565_s8, %s2566_s9  }
  0x17   : > { %p75_p0 = scmp.eq.s32.totalorder %s2562_s22, 0  ;;  %s4096_s10 = smov (%p32_p12, %s31_s10), 0 }
  0x18   : > { %p2682_p5 = por %p2641_p2, %p74_p13  ;;  %s64_s14 = ssub.s32 %s2558_s21, %s4096_s10 }
  0x19   : > { %p2676_p3 = por %p75_p0, %p74_p13  ;;  %p2239_p7 = scmp.lt.s32.totalorder %s2562_s22, 2 }
  0x1a   : > { %p65_p9 = scmp.eq.s32.totalorder %s64_s14, 0  ;;  %s209_s15 = sand.u32 1, %s2550_s19  }
  0x1b   : > { %s2105_s16 = sshll.u32 %s209_s15, 10  ;;  %s2214_s23 = sshll.u32 %s2558_s21, 5 }
  0x1c   : > { %s2691_s3 = scalar_select %p65_p9, %s2550_s19, %s67_s11  }
  0x1d   : > { %s218_s30 = scalar_lea.hbm %s4021_s1, %s2214_s23  ;;  %s213_s6 = scalar_lea.vmem [#allocation6], %s2105_s16 }
  0x1e   : > { %s221_s7 = sshll.u32 %s213_s6, 4  ;;  %s219_s25 = sshll.u32 %s218_s30, 4  ;;  %s222_s7 = int_to_ptr.vmem [resolvable:$true] %s221_s7  ;;  %s220_s25 = int_to_ptr.hbm [resolvable:$true] %s219_s25 }
  0x1f   : > { %p2231_p2 = pnand %p2239_p7, %p2676_p3  ;;  %s210_s8 = scalar_lea.sflag [#allocation7], %s209_s15 }
  0x20   : > { %s2567_s9 = smov 1024   ;;  %s2568_s0 = smov 512  }
  0x21   : > { %s2569_s14 = smov 32   ;;  %233 = sbr.rel (%p2660_p8) target bundleno = 512 (0x200), region = 36 }
  0x22   : > { %2233 = dma.hbm_to_vmem [thread:$0]  (!%p2231_p2), %s220_s25, 16384, %s222_s7, %s210_s8, %s2567_s9, %s2568_s0, %s2569_s14  }
  0x26   : > { %2529 = dma.done.wait (%p2637_p1), [#allocation4], 1024  }
  0x27   : > { %2531 = vsyncadd (%p2637_p1), [#allocation4], 4294966272  ;;  %s2706_s11 = sand.u32 1, %s2546_s18  }
  0x28   : > { %s2110_s12 = sshll.u32 %s2706_s11, 10  ;;  %s241_s15 = scalar_lea.sflag [#allocation7], %s2706_s11 }
  0x29   : > { %s2710_s16 = scalar_lea.vmem [#allocation6], %s2110_s12 }
  0x2a   : > { %2533 = dma.done.wait (%p2647_p4), %s241_s15, 16384  }
  0x2b   : > { %2535 = vsyncadd (%p2647_p4), %s241_s15, 4294950912  ;;  %v290_v0 = vld [vmem:[#allocation3 + $0x20] sm:$0xff]  ;;  %v291_v1 = vld [vmem:[#allocation3 + $0x28] sm:$0xff]  ;;  %s3488_s0 = sld [smem:[#allocation2]]  ;;  %s2112_s8 = sshll.u32 %s2554_s20, 9 }
  0x2c   : > { %v286_v2 = vld [vmem:[#allocation3] sm:$0xff]  ;;  %v298_v3 = vmul.f32 %v290_v0, %v290_v0  ;;  %v299_v4 = vmul.f32 %v291_v1, %v291_v1  ;;  %v287_v5 = vld [vmem:[#allocation3 + $0x8] sm:$0xff]  ;;  %v292_v7 = vld [vmem:[#allocation3 + $0x30] sm:$0xff]  ;;  %s2111_s9 = sshll.u32 %s2706_s11, 7  ;;  %s2215_s12 = sshll.u32 %s2554_s20, 5 }
  0x2d   : > { %v294_v6 = vmul.f32 %v286_v2, %v286_v2  ;;  %v293_v8 = vld [vmem:[#allocation3 + $0x38] sm:$0xff]  ;;  %v295_v9 = vmul.f32 %v287_v5, %v287_v5  ;;  %v288_v10 = vld [vmem:[#allocation3 + $0x10] sm:$0xff]  ;;  %v434_v12 = vld [vmem:[%s2710_s16] sm:$0xff]  ;;  %v300_v21 = vmul.f32 %v292_v7, %v292_v7  ;;  %s3644_s14 = scalar_lea.vmem [#allocation8], %s2111_s9  ;;  %s1968_s20 = scalar_lea.sflag [#allocation5], %s2706_s11 }
  0x2e   : > { %v289_v11 = vld [vmem:[#allocation3 + $0x18] sm:$0xff]  ;;  %v308_v13 = vadd.f32 %v299_v4, %v298_v3  ;;  %v438_v14 = vld [vmem:[%s2710_s16 + $0x20] sm:$0xff]  ;;  %v562_v17 = vmul.f32 %v434_v12, %v434_v12  ;;  %v301_v22 = vmul.f32 %v293_v8, %v293_v8  ;;  %v435_v24 = vld [vmem:[%s2710_s16 + $0x8] sm:$0xff]  ;;  %v296_v25 = vmul.f32 %v288_v10, %v288_v10  ;;  %s2496_s30 = scalar_lea.hbm %s4024_s4, 256 }
  0x2f   : > { %v442_v15 = vld [vmem:[%s2710_s16 + $0x40] sm:$0xff]  ;;  %v302_v18 = vadd.f32 %v295_v9, %v294_v6  ;;  %v566_v19 = vmul.f32 %v438_v14, %v438_v14  ;;  %v297_v26 = vmul.f32 %v289_v11, %v289_v11  ;;  %v439_v29 = vld [vmem:[%s2710_s16 + $0x28] sm:$0xff]  ;;  %v563_v33 = vmul.f32 %v435_v24, %v435_v24 }
  0x30   : > { %v446_v16 = vld [vmem:[%s2710_s16 + $0x60] sm:$0xff]  ;;  %v570_v20 = vmul.f32 %v442_v15, %v442_v15  ;;  %309 = vadd.xlane.f32.xlu1 %v308_v13  ;;  %v443_v30 = vld [vmem:[%s2710_s16 + $0x48] sm:$0xff]  ;;  %v567_v34 = vmul.f32 %v439_v29, %v439_v29  ;;  %v311_v39 = vadd.f32 %v301_v22, %v300_v21 }
  0x31   : > { %v450_v23 = vld [vmem:[%s2710_s16 + $0x80] sm:$0xff]  ;;  %303 = vadd.xlane.f32.xlu0 %v302_v18  ;;  %v574_v27 = vmul.f32 %v446_v16, %v446_v16  ;;  %v690_v28 = vadd.f32 %v566_v19, %v562_v17  ;;  %v447_v31 = vld [vmem:[%s2710_s16 + $0x68] sm:$0xff]  ;;  %v571_v35 = vmul.f32 %v443_v30, %v443_v30  ;;  %v305_v43 = vadd.f32 %v297_v26, %v296_v25  ;;  %s1853_s24 = sadd.f32 1.0, %s3488_s0  ;;  %s1982_s0 = scalar_lea.hbm %s4024_s4, %s2215_s12 }
  0x32   : > { %v454_v32 = vld [vmem:[%s2710_s16 + $0xa0] sm:$0xff]  ;;  %v578_v36 = vmul.f32 %v450_v23, %v450_v23  ;;  %v451_v38 = vld [vmem:[%s2710_s16 + $0x88] sm:$0xff]  ;;  %v575_v41 = vmul.f32 %v447_v31, %v447_v31  ;;  %v727_v42 = vadd.f32 %v567_v34, %v563_v33  ;;  %s1985_s26 = sshll.u32 %s1982_s0, 4  ;;  %s1986_s26 = int_to_ptr.hbm [resolvable:$true] %s1985_s26 }
  0x33   : > { %v691_v37 = vadd.f32 %v690_v28, %v570_v20  ;;  %v458_v40 = vld [vmem:[%s2710_s16 + $0xc0] sm:$0xff]  ;;  %v582_v44 = vmul.f32 %v454_v32, %v454_v32  ;;  %v455_v46 = vld [vmem:[%s2710_s16 + $0xa8] sm:$0xff]  ;;  %v579_v48 = vmul.f32 %v451_v38, %v451_v38  ;;  %s2490_s5 = sshra.s32 %s1986_s26, 4  ;;  %s2491_s5 = int_to_ptr.hbm [resolvable:$true] %s2490_s5 }
  0x34   : > { %v462_v47 = vld [vmem:[%s2710_s16 + $0xe0] sm:$0xff]  ;;  %v728_v49 = vadd.f32 %v727_v42, %v571_v35  ;;  %v586_v50 = vmul.f32 %v458_v40, %v458_v40  ;;  %v459_v52 = vld [vmem:[%s2710_s16 + $0xc8] sm:$0xff]  ;;  %v583_v54 = vmul.f32 %v455_v46, %v455_v46  ;;  %s2492_s23 = scalar_lea.hbm %s2491_s5, 128  ;;  %p2497_p10 = scmp.lt.s32.totalorder %s2491_s5, %s4024_s4 }
  0x35   : > { %v692_v45 = vadd.f32 %v691_v37, %v574_v27  ;;  %v2732_v53 = vld [vmem:[%s2710_s16 + $0x100] sm:$0xff]  ;;  %v590_v56 = vmul.f32 %v462_v47, %v462_v47  ;;  %v463_v58 = vld [vmem:[%s2710_s16 + $0xe8] sm:$0xff]  ;;  %v587_v60 = vmul.f32 %v459_v52, %v459_v52  ;;  %p2493_p1 = scmp.ne.s32.totalorder %s2491_s5, %s2492_s23  ;;  %p2498_p12 = scmp.lt.s32.totalorder %s2496_s30, %s2492_s23 }
  0x36   : > { %v729_v55 = vadd.f32 %v728_v49, %v575_v41  ;;  %v2736_v59 = vld [vmem:[%s2710_s16 + $0x120] sm:$0xff]  ;;  %v594_v62 = vmul.f32 %v2732_v53, %v2732_v53  ;;  %v2741_v0 = vld [vmem:[%s2710_s16 + $0x108] sm:$0xff]  ;;  %v591_v2 = vmul.f32 %v463_v58, %v463_v58 }
  0x37   : > { %v693_v51 = vadd.f32 %v692_v45, %v578_v36  ;;  %v2744_v1 = vld [vmem:[%s2710_s16 + $0x140] sm:$0xff]  ;;  %v598_v4 = vmul.f32 %v2736_v59, %v2736_v59  ;;  %v2749_v6 = vld [vmem:[%s2710_s16 + $0x128] sm:$0xff]  ;;  %v595_v8 = vmul.f32 %v2741_v0, %v2741_v0  ;;  %p2494_p4 = pnand %p2493_p1, %p2682_p5  ;;  %p2499_p13 = por %p2498_p12, %p2497_p10 }
  0x38   : > { %312 = vadd.xlane.f32.xlu1 %v311_v39  ;;  %v730_v61 = vadd.f32 %v729_v55, %v579_v48  ;;  %v2752_v7 = vld [vmem:[%s2710_s16 + $0x160] sm:$0xff]  ;;  %v602_v10 = vmul.f32 %v2744_v1, %v2744_v1  ;;  %v2759_v12 = vld [vmem:[%s2710_s16 + $0x148] sm:$0xff]  ;;  %v599_v14 = vmul.f32 %v2749_v6, %v2749_v6 }
  0x39   : > { %306 = vadd.xlane.f32.xlu0 %v305_v43  ;;  %v694_v57 = vadd.f32 %v693_v51, %v582_v44  ;;  %v2762_v13 = vld [vmem:[%s2710_s16 + $0x180] sm:$0xff]  ;;  %v606_v16 = vmul.f32 %v2752_v7, %v2752_v7  ;;  %v2769_v18 = vld [vmem:[%s2710_s16 + $0x168] sm:$0xff]  ;;  %v603_v20 = vmul.f32 %v2759_v12, %v2759_v12  ;;  %p2495_p8 = pneg %p2494_p4 }
  0x3a   : > { %v731_v3 = vadd.f32 %v730_v61, %v583_v54  ;;  %v2772_v19 = vld [vmem:[%s2710_s16 + $0x1a0] sm:$0xff]  ;;  %v610_v22 = vmul.f32 %v2762_v13, %v2762_v13  ;;  %v2779_v24 = vld [vmem:[%s2710_s16 + $0x188] sm:$0xff]  ;;  %v607_v26 = vmul.f32 %v2769_v18, %v2769_v18 }
  0x3b   : > { %v695_v63 = vadd.f32 %v694_v57, %v586_v50  ;;  %v2782_v25 = vld [vmem:[%s2710_s16 + $0x1c0] sm:$0xff]  ;;  %v614_v28 = vmul.f32 %v2772_v19, %v2772_v19  ;;  %v2789_v30 = vld [vmem:[%s2710_s16 + $0x1a8] sm:$0xff]  ;;  %v611_v32 = vmul.f32 %v2779_v24, %v2779_v24  ;;  %p2500_p0 = pnand %p2499_p13, %p2495_p8 }
  0x3c   : > { %v732_v9 = vadd.f32 %v731_v3, %v587_v60  ;;  %v2792_v31 = vld [vmem:[%s2710_s16 + $0x1e0] sm:$0xff]  ;;  %v618_v34 = vmul.f32 %v2782_v25, %v2782_v25  ;;  %v2799_v36 = vld [vmem:[%s2710_s16 + $0x1c8] sm:$0xff]  ;;  %v615_v38 = vmul.f32 %v2789_v30, %v2789_v30 }
  0x3d   : > { %v696_v5 = vadd.f32 %v695_v63, %v590_v56  ;;  %v498_v37 = vld [vmem:[%s2710_s16 + $0x200] sm:$0xff]  ;;  %v622_v40 = vmul.f32 %v2792_v31, %v2792_v31  ;;  %v2807_v42 = vld [vmem:[%s2710_s16 + $0x1e8] sm:$0xff]  ;;  %v619_v44 = vmul.f32 %v2799_v36, %v2799_v36  ;;  %v437_v63 = vld [vmem:[%s2710_s16 + $0x18] sm:$0xff] }
  0x3e   : > { %v733_v15 = vadd.f32 %v732_v9, %v591_v2  ;;  %v502_v43 = vld [vmem:[%s2710_s16 + $0x220] sm:$0xff]  ;;  %v626_v46 = vmul.f32 %v498_v37, %v498_v37  ;;  %v499_v48 = vld [vmem:[%s2710_s16 + $0x208] sm:$0xff]  ;;  %v623_v50 = vmul.f32 %v2807_v42, %v2807_v42  ;;  %v441_v2 = vld [vmem:[%s2710_s16 + $0x38] sm:$0xff] }
  0x3f   : > { %v697_v11 = vadd.f32 %v696_v5, %v594_v62  ;;  %v506_v49 = vld [vmem:[%s2710_s16 + $0x240] sm:$0xff]  ;;  %v630_v52 = vmul.f32 %v502_v43, %v502_v43  ;;  %v503_v55 = vld [vmem:[%s2710_s16 + $0x228] sm:$0xff]  ;;  %v627_v57 = vmul.f32 %v499_v48, %v499_v48  ;;  %v569_v9 = vmul.f32 %v441_v2, %v441_v2  ;;  %v440_v2 = vld [vmem:[%s2710_s16 + $0x30] sm:$0xff] }
  0x40   : > { %v734_v21 = vadd.f32 %v733_v15, %v595_v8  ;;  %v510_v56 = vld [vmem:[%s2710_s16 + $0x260] sm:$0xff]  ;;  %v634_v60 = vmul.f32 %v506_v49, %v506_v49  ;;  %v507_v62 = vld [vmem:[%s2710_s16 + $0x248] sm:$0xff]  ;;  %v565_v8 = vmul.f32 %v437_v63, %v437_v63  ;;  %v445_v15 = vld [vmem:[%s2710_s16 + $0x58] sm:$0xff] }
  0x41   : > { %v698_v17 = vadd.f32 %v697_v11, %v598_v4  ;;  %v2822_v3 = vld [vmem:[%s2710_s16 + $0x280] sm:$0xff]  ;;  %v631_v4 = vmul.f32 %v503_v55, %v503_v55  ;;  %v2848_v43 = vld [vmem:[%s2710_s16 + $0x2c8] sm:$0xff]  ;;  %v436_v63 = vld [vmem:[%s2710_s16 + $0x10] sm:$0xff] }
  0x42   : > { %v735_v27 = vadd.f32 %v734_v21, %v599_v14  ;;  %4052 = vst [vmem:[#allocation12_spill] sm:$0xff] %v2822_v3  ;;  %v511_v14 = vld [vmem:[%s2710_s16 + $0x268] sm:$0xff]  ;;  %v573_v21 = vmul.f32 %v445_v15, %v445_v15 }
  0x43   : > { %v699_v23 = vadd.f32 %v698_v17, %v602_v10  ;;  %v638_v10 = vmul.f32 %v510_v56, %v510_v56  ;;  %v635_v17 = vmul.f32 %v507_v62, %v507_v62  ;;  %v461_v62 = vld [vmem:[%s2710_s16 + $0xd8] sm:$0xff] }
  0x44   : > { %v736_v33 = vadd.f32 %v735_v27, %v603_v20  ;;  %v2832_v27 = vld [vmem:[%s2710_s16 + $0x288] sm:$0xff] }
  0x45   : > { %v700_v29 = vadd.f32 %v699_v23, %v606_v16  ;;  %v2827_v16 = vld [vmem:[%s2710_s16 + $0x2a0] sm:$0xff]  ;;  %v642_v23 = vmul.f32 %v2822_v3, %v2822_v3  ;;  %4054 = vst [vmem:[#allocation14_spill] sm:$0xff] %v2832_v27 }
  0x46   : > { %v737_v39 = vadd.f32 %v736_v33, %v607_v26  ;;  %4053 = vst [vmem:[#allocation13_spill] sm:$0xff] %v2827_v16  ;;  %v646_v37 = vmul.f32 %v2827_v16, %v2827_v16 }
  0x47   : > { %v701_v35 = vadd.f32 %v700_v29, %v610_v22  ;;  %v801_v22 = vadd.f32 %v569_v9, %v565_v8  ;;  %v2836_v29 = vld [vmem:[%s2710_s16 + $0x2c0] sm:$0xff]  ;;  %v589_v9 = vmul.f32 %v461_v62, %v461_v62 }
  0x48   : > { %v738_v45 = vadd.f32 %v737_v39, %v611_v32  ;;  %v639_v32 = vmul.f32 %v511_v14, %v511_v14  ;;  %v2841_v39 = vld [vmem:[%s2710_s16 + $0x2a8] sm:$0xff]  ;;  %v650_v48 = vmul.f32 %v2836_v29, %v2836_v29 }
  0x49   : > { %v702_v41 = vadd.f32 %v701_v35, %v614_v28  ;;  %v449_v28 = vld [vmem:[%s2710_s16 + $0x78] sm:$0xff]  ;;  %v802_v35 = vadd.f32 %v801_v22, %v573_v21  ;;  %4055 = vst [vmem:[#allocation15_spill] sm:$0xff] %v2841_v39  ;;  %v444_v21 = vld [vmem:[%s2710_s16 + $0x50] sm:$0xff]  ;;  %v568_v22 = vmul.f32 %v440_v2, %v440_v2 }
  0x4a   : > { %v739_v51 = vadd.f32 %v738_v45, %v615_v38 }
  0x4b   : > { %v703_v47 = vadd.f32 %v702_v41, %v618_v34  ;;  %v577_v34 = vmul.f32 %v449_v28, %v449_v28  ;;  %v2845_v41 = vld [vmem:[%s2710_s16 + $0x2e0] sm:$0xff] }
  0x4c   : > { %v740_v58 = vadd.f32 %v739_v51, %v619_v44  ;;  %v643_v44 = vmul.f32 %v2832_v27, %v2832_v27  ;;  %v2856_v51 = vld [vmem:[%s2710_s16 + $0x300] sm:$0xff] }
  0x4d   : > { %v704_v54 = vadd.f32 %v703_v47, %v622_v40  ;;  %v453_v40 = vld [vmem:[%s2710_s16 + $0x98] sm:$0xff]  ;;  %v803_v47 = vadd.f32 %v802_v35, %v577_v34  ;;  %v658_v14 = vmul.f32 %v2856_v51, %v2856_v51  ;;  %v572_v34 = vmul.f32 %v444_v21, %v444_v21  ;;  %v456_v21 = vld [vmem:[%s2710_s16 + $0xb0] sm:$0xff] }
  0x4e   : > { %v741_v5 = vadd.f32 %v740_v58, %v623_v50  ;;  %v457_v50 = vld [vmem:[%s2710_s16 + $0xb8] sm:$0xff]  ;;  %v654_v58 = vmul.f32 %v2845_v41, %v2845_v41 }
  0x4f   : > { %v705_v61 = vadd.f32 %v704_v54, %v626_v46  ;;  %v581_v46 = vmul.f32 %v453_v40, %v453_v40  ;;  %v647_v54 = vmul.f32 %v2841_v39, %v2841_v39  ;;  %v585_v56 = vmul.f32 %v457_v50, %v457_v50  ;;  %v469_v40 = vld [vmem:[%s2710_s16 + $0x118] sm:$0xff] }
  0x50   : > { %v742_v20 = vadd.f32 %v741_v5, %v627_v57  ;;  %v2874_v5 = vld [vmem:[%s2710_s16 + $0x308] sm:$0xff] }
  0x51   : > { %v706_v11 = vadd.f32 %v705_v61, %v630_v52  ;;  %v2859_v52 = vld [vmem:[%s2710_s16 + $0x2e8] sm:$0xff]  ;;  %v804_v57 = vadd.f32 %v803_v47, %v581_v46  ;;  %v651_v61 = vmul.f32 %v2848_v43, %v2848_v43  ;;  %v2895_v46 = vld [vmem:[%s2710_s16 + $0x360] sm:$0xff] }
  0x52   : > { %v743_v33 = vadd.f32 %v742_v20, %v631_v4  ;;  %4056 = vst [vmem:[#allocation16_spill] sm:$0xff] %v2859_v52  ;;  %v2871_v4 = vld [vmem:[%s2710_s16 + $0x320] sm:$0xff]  ;;  %v465_v20 = vld [vmem:[%s2710_s16 + $0xf8] sm:$0xff]  ;;  %v2898_v47 = vld [vmem:[%s2710_s16 + $0x348] sm:$0xff] }
  0x53   : > { %v707_v26 = vadd.f32 %v706_v11, %v634_v60  ;;  %v564_v11 = vmul.f32 %v436_v63, %v436_v63  ;;  %v662_v35 = vmul.f32 %v2871_v4, %v2871_v4  ;;  %v2907_v63 = vld [vmem:[%s2710_s16 + $0x380] sm:$0xff] }
  0x54   : > { %v744_v45 = vadd.f32 %v743_v33, %v635_v17  ;;  %v655_v17 = vmul.f32 %v2859_v52, %v2859_v52 }
  0x55   : > { %v708_v38 = vadd.f32 %v707_v26, %v638_v10  ;;  %v805_v10 = vadd.f32 %v804_v57, %v585_v56  ;;  %v2886_v26 = vld [vmem:[%s2710_s16 + $0x328] sm:$0xff] }
  0x56   : > { %v745_v55 = vadd.f32 %v744_v45, %v639_v32  ;;  %v593_v32 = vmul.f32 %v465_v20, %v465_v20  ;;  %v764_v45 = vadd.f32 %v568_v22, %v564_v11  ;;  %v663_v57 = vmul.f32 %v2886_v26, %v2886_v26  ;;  %v477_v20 = vld [vmem:[%s2710_s16 + $0x158] sm:$0xff] }
  0x57   : > { %v709_v49 = vadd.f32 %v708_v38, %v642_v23  ;;  %v2883_v23 = vld [vmem:[%s2710_s16 + $0x340] sm:$0xff]  ;;  %v806_v33 = vadd.f32 %v805_v10, %v589_v9  ;;  %v659_v38 = vmul.f32 %v2874_v5, %v2874_v5  ;;  %v670_v11 = vmul.f32 %v2895_v46, %v2895_v46 }
  0x58   : > { %v746_v8 = vadd.f32 %v745_v55, %v643_v44  ;;  %v448_v44 = vld [vmem:[%s2710_s16 + $0x70] sm:$0xff]  ;;  %v666_v55 = vmul.f32 %v2883_v23, %v2883_v23  ;;  %v765_v62 = vadd.f32 %v764_v45, %v572_v34  ;;  %v481_v45 = vld [vmem:[%s2710_s16 + $0x178] sm:$0xff] }
  0x59   : > { %v710_v60 = vadd.f32 %v709_v49, %v646_v37  ;;  %v597_v49 = vmul.f32 %v469_v40, %v469_v40  ;;  %v807_v50 = vadd.f32 %v806_v33, %v593_v32  ;;  %v605_v33 = vmul.f32 %v477_v20, %v477_v20  ;;  %v2946_v20 = vld [vmem:[%s2710_s16 + $0x3c8] sm:$0xff] }
  0x5a   : > { %v747_v28 = vadd.f32 %v746_v8, %v647_v54  ;;  %v576_v54 = vmul.f32 %v448_v44, %v448_v44 }
  0x5b   : > { %v711_v15 = vadd.f32 %v710_v60, %v650_v48  ;;  %v452_v60 = vld [vmem:[%s2710_s16 + $0x90] sm:$0xff]  ;;  %v808_v9 = vadd.f32 %v807_v50, %v597_v49  ;;  %v2931_v50 = vld [vmem:[%s2710_s16 + $0x3c0] sm:$0xff] }
  0x5c   : > { %v748_v48 = vadd.f32 %v747_v28, %v651_v61  ;;  %v2910_v61 = vld [vmem:[%s2710_s16 + $0x368] sm:$0xff]  ;;  %v580_v10 = vmul.f32 %v452_v60, %v452_v60  ;;  %v766_v22 = vadd.f32 %v765_v62, %v576_v54  ;;  %v2919_v28 = vld [vmem:[%s2710_s16 + $0x3a0] sm:$0xff] }
  0x5d   : > { %v712_v37 = vadd.f32 %v711_v15, %v654_v58  ;;  %v473_v58 = vld [vmem:[%s2710_s16 + $0x138] sm:$0xff]  ;;  %v667_v15 = vmul.f32 %v2898_v47, %v2898_v47  ;;  %v671_v44 = vmul.f32 %v2910_v61, %v2910_v61 }
  0x5e   : > { %v749_v2 = vadd.f32 %v748_v48, %v655_v17  ;;  %v601_v8 = vmul.f32 %v473_v58, %v473_v58  ;;  %v2922_v17 = vld [vmem:[%s2710_s16 + $0x388] sm:$0xff]  ;;  %v460_v48 = vld [vmem:[%s2710_s16 + $0xd0] sm:$0xff]  ;;  %v767_v49 = vadd.f32 %v766_v22, %v580_v10 }
  0x5f   : > { %v713_v56 = vadd.f32 %v712_v37, %v658_v14  ;;  %v584_v37 = vmul.f32 %v456_v21, %v456_v21  ;;  %v588_v60 = vmul.f32 %v460_v48, %v460_v48  ;;  %v2955_v48 = vld [vmem:[%s2710_s16 + $0x3e8] sm:$0xff] }
  0x60   : > { %v750_v32 = vadd.f32 %v749_v2, %v659_v38  ;;  %v809_v34 = vadd.f32 %v808_v9, %v601_v8  ;;  %v2934_v38 = vld [vmem:[%s2710_s16 + $0x3a8] sm:$0xff]  ;;  %v675_v2 = vmul.f32 %v2922_v17, %v2922_v17  ;;  %v485_v8 = vld [vmem:[%s2710_s16 + $0x198] sm:$0xff]  ;;  %v464_v9 = vld [vmem:[%s2710_s16 + $0xf0] sm:$0xff] }
  0x61   : > { %v714_v14 = vadd.f32 %v713_v56, %v662_v35  ;;  %v674_v35 = vmul.f32 %v2907_v63, %v2907_v63  ;;  %v609_v56 = vmul.f32 %v481_v45, %v481_v45  ;;  %v768_v10 = vadd.f32 %v767_v49, %v584_v37  ;;  %v468_v45 = vld [vmem:[%s2710_s16 + $0x110] sm:$0xff] }
  0x62   : > { %v751_v54 = vadd.f32 %v750_v32, %v663_v57  ;;  %v810_v58 = vadd.f32 %v809_v34, %v605_v33  ;;  %v613_v21 = vmul.f32 %v485_v8, %v485_v8  ;;  %v592_v32 = vmul.f32 %v464_v9, %v464_v9  ;;  %v472_v9 = vld [vmem:[%s2710_s16 + $0x130] sm:$0xff] }
  0x63   : > { %v715_v40 = vadd.f32 %v714_v14, %v666_v55  ;;  %v678_v55 = vmul.f32 %v2919_v28, %v2919_v28  ;;  %v2943_v14 = vld [vmem:[%s2710_s16 + $0x3e0] sm:$0xff]  ;;  %v679_v34 = vmul.f32 %v2934_v38, %v2934_v38  ;;  %v769_v37 = vadd.f32 %v768_v10, %v588_v60 }
  0x64   : > { %v752_v57 = vadd.f32 %v751_v54, %v667_v15  ;;  %v811_v22 = vadd.f32 %v810_v58, %v609_v56  ;;  %v596_v56 = vmul.f32 %v468_v45, %v468_v45  ;;  %v686_v58 = vmul.f32 %v2943_v14, %v2943_v14  ;;  %v476_v45 = vld [vmem:[%s2710_s16 + $0x150] sm:$0xff] }
  0x65   : > { %v716_v62 = vadd.f32 %v715_v40, %v670_v11  ;;  %v682_v11 = vmul.f32 %v2931_v50, %v2931_v50  ;;  %v489_v40 = vld [vmem:[%s2710_s16 + $0x1b8] sm:$0xff]  ;;  %v770_v39 = vadd.f32 %v769_v37, %v592_v32  ;;  %v604_v3 = vmul.f32 %v476_v45, %v476_v45 }
  0x66   : > { %v753_v49 = vadd.f32 %v752_v57, %v671_v44  ;;  %v617_v15 = vmul.f32 %v489_v40, %v489_v40  ;;  %v812_v54 = vadd.f32 %v811_v22, %v613_v21  ;;  %v600_v57 = vmul.f32 %v472_v9, %v472_v9  ;;  %v497_v22 = vld [vmem:[%s2710_s16 + $0x1f8] sm:$0xff]  ;;  %v484_v9 = vld [vmem:[%s2710_s16 + $0x190] sm:$0xff] }
  0x67   : > { %v717_v33 = vadd.f32 %v716_v62, %v674_v35  ;;  %v683_v35 = vmul.f32 %v2946_v20, %v2946_v20  ;;  %v493_v62 = vld [vmem:[%s2710_s16 + $0x1d8] sm:$0xff]  ;;  %v687_v21 = vmul.f32 %v2955_v48, %v2955_v48  ;;  %v625_v27 = vmul.f32 %v497_v22, %v497_v22 }
  0x68   : > { %v754_v60 = vadd.f32 %v753_v49, %v675_v2  ;;  %v621_v10 = vmul.f32 %v493_v62, %v493_v62  ;;  %v813_v44 = vadd.f32 %v812_v54, %v617_v15  ;;  %v501_v32 = vld [vmem:[%s2710_s16 + $0x218] sm:$0xff]  ;;  %v480_v2 = vld [vmem:[%s2710_s16 + $0x170] sm:$0xff] }
  0x69   : > { %v718_v8 = vadd.f32 %v717_v33, %v678_v55  ;;  %v771_v55 = vadd.f32 %v770_v39, %v596_v56  ;;  %v608_v54 = vmul.f32 %v480_v2, %v480_v2  ;;  %v505_v62 = vld [vmem:[%s2710_s16 + $0x238] sm:$0xff] }
  0x6a   : > { %v755_v33 = vadd.f32 %v754_v60, %v679_v34  ;;  %v814_v16 = vadd.f32 %v813_v44, %v621_v10  ;;  %v633_v56 = vmul.f32 %v505_v62, %v505_v62  ;;  %v612_v10 = vmul.f32 %v484_v9, %v484_v9  ;;  %v509_v44 = vld [vmem:[%s2710_s16 + $0x258] sm:$0xff] }
  0x6b   : > { %v719_v40 = vadd.f32 %v718_v8, %v682_v11  ;;  %v772_v37 = vadd.f32 %v771_v55, %v600_v57  ;;  %v629_v11 = vmul.f32 %v501_v32, %v501_v32  ;;  %v637_v22 = vmul.f32 %v509_v44, %v509_v44  ;;  %v513_v55 = vld [vmem:[%s2710_s16 + $0x278] sm:$0xff] }
  0x6c   : > { %v756_v49 = vadd.f32 %v755_v33, %v683_v35  ;;  %v815_v15 = vadd.f32 %v814_v16, %v625_v27  ;;  %v492_v33 = vld [vmem:[%s2710_s16 + $0x1d0] sm:$0xff]  ;;  %v641_v32 = vmul.f32 %v513_v55, %v513_v55 }
  0x6d   : > { %v720_v52 = vadd.f32 %v719_v40, %v686_v58  ;;  %v773_v39 = vadd.f32 %v772_v37, %v604_v3  ;;  %v488_v40 = vld [vmem:[%s2710_s16 + $0x1b0] sm:$0xff]  ;;  %v620_v37 = vmul.f32 %v492_v33, %v492_v33 }
  0x6e   : > { %v757_v34 = vadd.f32 %v756_v49, %v687_v21  ;;  %v816_v60 = vadd.f32 %v815_v15, %v629_v11  ;;  %v616_v27 = vmul.f32 %v488_v40, %v488_v40  ;;  %v517_v49 = vld [vmem:[%s2710_s16 + $0x298] sm:$0xff]  ;;  %v496_v11 = vld [vmem:[%s2710_s16 + $0x1f0] sm:$0xff] }
  0x6f   : > { %v721_v8 = vrot.slane %v720_v52, 4  ;;  %v774_v57 = vadd.f32 %v773_v39, %v608_v54  ;;  %v624_v9 = vmul.f32 %v496_v11, %v496_v11  ;;  %v2997_v11 = vld [vmem:[%s2710_s16 + $0x318] sm:$0xff] }
  0x70   : > { %v758_v35 = vrot.slane %v757_v34, 4  ;;  %v817_v16 = vadd.f32 %v816_v60, %v633_v56  ;;  %v521_v56 = vld [vmem:[%s2710_s16 + $0x2b8] sm:$0xff]  ;;  %v500_v60 = vld [vmem:[%s2710_s16 + $0x210] sm:$0xff]  ;;  %4059 = vst [vmem:[#allocation19_spill] sm:$0xff] %v2997_v11 }
  0x71   : > { %v722_v58 = vadd.f32 %v721_v8, %v720_v52  ;;  %v775_v3 = vadd.f32 %v774_v57, %v612_v10  ;;  %v645_v8 = vmul.f32 %v517_v49, %v517_v49  ;;  %v649_v44 = vmul.f32 %v521_v56, %v521_v56 }
  0x72   : > { %v759_v21 = vadd.f32 %v758_v35, %v757_v34  ;;  %v818_v2 = vadd.f32 %v817_v16, %v637_v22  ;;  %v628_v57 = vmul.f32 %v500_v60, %v500_v60  ;;  %v2982_v35 = vld [vmem:[%s2710_s16 + $0x2d8] sm:$0xff]  ;;  %v504_v22 = vld [vmem:[%s2710_s16 + $0x230] sm:$0xff] }
  0x73   : > { %v723_v45 = vrot.slane %v722_v58, 2  ;;  %v776_v15 = vadd.f32 %v775_v3, %v616_v27  ;;  %4057 = vst [vmem:[#allocation17_spill] sm:$0xff] %v2982_v35  ;;  %v632_v33 = vmul.f32 %v504_v22, %v504_v22  ;;  %v2989_v3 = vld [vmem:[%s2710_s16 + $0x2f8] sm:$0xff] }
  0x74   : > { %v760_v54 = vrot.slane %v759_v21, 2  ;;  %v819_v62 = vadd.f32 %v818_v2, %v641_v32  ;;  %4058 = vst [vmem:[#allocation18_spill] sm:$0xff] %v2989_v3 }
  0x75   : > { %v724_v52 = vadd.f32 %v723_v45, %v722_v58  ;;  %v777_v10 = vadd.f32 %v776_v15, %v620_v37  ;;  %v653_v45 = vmul.f32 %v2982_v35, %v2982_v35  ;;  %v657_v37 = vmul.f32 %v2989_v3, %v2989_v3  ;;  %v512_v15 = vld [vmem:[%s2710_s16 + $0x270] sm:$0xff] }
  0x76   : > { %v761_v34 = vadd.f32 %v760_v54, %v759_v21  ;;  %v820_v40 = vadd.f32 %v819_v62, %v645_v8  ;;  %v508_v21 = vld [vmem:[%s2710_s16 + $0x250] sm:$0xff]  ;;  %v661_v8 = vmul.f32 %v2997_v11, %v2997_v11  ;;  %v640_v56 = vmul.f32 %v512_v15, %v512_v15 }
  0x77   : > { %v725_v39 = vrot.slane %v724_v52, 1  ;;  %v778_v16 = vadd.f32 %v777_v10, %v624_v9  ;;  %v636_v49 = vmul.f32 %v508_v21, %v508_v21  ;;  %v3004_v9 = vld [vmem:[%s2710_s16 + $0x338] sm:$0xff]  ;;  %v3033_v3 = vld [vmem:[%s2710_s16 + $0x310] sm:$0xff] }
  0x78   : > { %v762_v27 = vrot.slane %v761_v34, 1  ;;  %v821_v55 = vadd.f32 %v820_v40, %v649_v44  ;;  %4060 = vst [vmem:[#allocation20_spill] sm:$0xff] %v3004_v9  ;;  %v665_v10 = vmul.f32 %v3004_v9, %v3004_v9  ;;  %v3010_v40 = vld [vmem:[%s2710_s16 + $0x358] sm:$0xff] }
  0x79   : > { %v2979_v58 = vadd.f32 %v725_v39, %v724_v52  ;;  %v779_v32 = vadd.f32 %v778_v16, %v628_v57  ;;  %v516_v39 = vld [vmem:[%s2710_s16 + $0x290] sm:$0xff]  ;;  %4061 = vst [vmem:[#allocation21_spill] sm:$0xff] %v3010_v40 }
  0x7a   : > { %v2992_v2 = vadd.f32 %v762_v27, %v761_v34  ;;  %v822_v52 = vadd.f32 %v821_v55, %v653_v45  ;;  %v520_v57 = vld [vmem:[%s2710_s16 + $0x2b0] sm:$0xff]  ;;  %v644_v22 = vmul.f32 %v516_v39, %v516_v39  ;;  %v669_v27 = vmul.f32 %v3010_v40, %v3010_v40  ;;  %v3017_v45 = vld [vmem:[%s2710_s16 + $0x378] sm:$0xff]  ;;  %4063 = vst [vmem:[#allocation23_spill] sm:$0xff] %v3033_v3 }
  0x7b   : > { %2304 = vrsqrt.f32 %v2979_v58  ;;  %v780_v54 = vadd.f32 %v779_v32, %v632_v33  ;;  %4062 = vst [vmem:[#allocation22_spill] sm:$0xff] %v3017_v45  ;;  %v524_v33 = vld [vmem:[%s2710_s16 + $0x2d0] sm:$0xff]  ;;  %v648_v21 = vmul.f32 %v520_v57, %v520_v57  ;;  %vm845_vm0 = vcmp.eq.f32.partialorder %v2979_v58, inf }
  0x7c   : > { %2306 = vrsqrt.f32 %v2992_v2  ;;  %v823_v62 = vadd.f32 %v822_v52, %v657_v37  ;;  %v652_v39 = vmul.f32 %v524_v33, %v524_v33  ;;  %vm847_vm1 = vcmp.eq.f32.partialorder %v2979_v58, 0.0 }
  0x7d   : > { %v781_v60 = vadd.f32 %v780_v54, %v636_v49  ;;  %v673_v49 = vmul.f32 %v3017_v45, %v3017_v45  ;;  %v3024_v54 = vld [vmem:[%s2710_s16 + $0x398] sm:$0xff]  ;;  %vm857_vm2 = vcmp.eq.f32.partialorder %v2992_v2, inf  ;;  %vm859_vm3 = vcmp.eq.f32.partialorder %v2992_v2, 0.0 }
  0x7e   : > { %v824_v34 = vadd.f32 %v823_v62, %v661_v8  ;;  %v528_v62 = vld [vmem:[%s2710_s16 + $0x2f0] sm:$0xff]  ;;  %v677_v57 = vmul.f32 %v3024_v54, %v3024_v54 }
  0x7f   : > { %v782_v32 = vadd.f32 %v781_v60, %v640_v56  ;;  %v3030_v60 = vld [vmem:[%s2710_s16 + $0x3b8] sm:$0xff]  ;;  %v656_v35 = vmul.f32 %v528_v62, %v528_v62 }
  0x80   : > { %v825_v55 = vadd.f32 %v824_v34, %v665_v10 }
  0x81   : > { %v2305_v44 = vpop.eup %2304  ;;  %v783_v10 = vadd.f32 %v782_v32, %v644_v22  ;;  %v3038_v22 = vld [vmem:[%s2710_s16 + $0x3d8] sm:$0xff]  ;;  %v3041_v32 = vld [vmem:[%s2710_s16 + $0x330] sm:$0xff] }
  0x82   : > { %v839_v16 = vmul.f32 %v2305_v44, %v2979_v58  ;;  %v2307_v37 = vpop.eup %2306  ;;  %v826_v8 = vadd.f32 %v825_v55, %v669_v27  ;;  %v681_v27 = vmul.f32 %v3030_v60, %v3030_v60  ;;  %4064 = vst [vmem:[#allocation24_spill] sm:$0xff] %v3041_v32 }
  0x83   : > { %v851_v15 = vmul.f32 %v2307_v37, %v2992_v2  ;;  %v784_v9 = vadd.f32 %v783_v10, %v648_v21  ;;  %v848_v21 = vand.u32 2147483648, %v2979_v58  ;;  %v3050_v10 = vld [vmem:[%s2710_s16 + $0x3f8] sm:$0xff] }
  0x84   : > { %v840_v52 = vmul.f32 %v2305_v44, %v839_v16  ;;  %v827_v16 = vadd.f32 %v826_v8, %v673_v49  ;;  %v685_v8 = vmul.f32 %v3038_v22, %v3038_v22 }
  0x85   : > { %v852_v56 = vmul.f32 %v2307_v37, %v851_v15  ;;  %v785_v49 = vadd.f32 %v784_v9, %v652_v39 }
  0x86   : > { %v841_v34 = vmul.f32 0.5, %v840_v52  ;;  %v828_v33 = vadd.f32 %v827_v16, %v677_v57  ;;  %v660_v52 = vmul.f32 %v3033_v3, %v3033_v3  ;;  %v3053_v57 = vld [vmem:[%s2710_s16 + $0x350] sm:$0xff] }
  0x87   : > { %v853_v55 = vmul.f32 0.5, %v852_v56  ;;  %4065 = vst [vmem:[#allocation25_spill] sm:$0xff] %v3053_v57  ;;  %v664_v56 = vmul.f32 %v3041_v32, %v3041_v32  ;;  %v786_v16 = vadd.f32 %v785_v49, %v656_v35  ;;  %v860_v49 = vand.u32 2147483648, %v2992_v2 }
  0x88   : > { %v842_v11 = vsub.f32 1.5, %v841_v34  ;;  %v829_v34 = vadd.f32 %v828_v33, %v681_v27  ;;  %v668_v27 = vmul.f32 %v3053_v57, %v3053_v57 }
  0x89   : > { %v854_v62 = vsub.f32 1.5, %v853_v55  ;;  %v3062_v55 = vld [vmem:[%s2710_s16 + $0x370] sm:$0xff]  ;;  %v787_v33 = vadd.f32 %v786_v16, %v660_v52 }
  0x8a   : > { %v843_v15 = vmul.f32 %v2305_v44, %v842_v11  ;;  %v689_v11 = vmul.f32 %v3050_v10, %v3050_v10  ;;  %v830_v39 = vadd.f32 %v829_v34, %v685_v8  ;;  %4066 = vst [vmem:[#allocation26_spill] sm:$0xff] %v3062_v55  ;;  %v672_v52 = vmul.f32 %v3062_v55, %v3062_v55 }
  0x8b   : > { %v855_v44 = vmul.f32 %v2307_v37, %v854_v62  ;;  %v788_v62 = vadd.f32 %v787_v33, %v664_v56  ;;  %v3082_v56 = vld [vmem:[%s2710_s16 + $0x3b0] sm:$0xff] }
  0x8c   : > { %v844_v9 = vmul.f32 %v843_v15, %v2979_v58  ;;  %v831_v8 = vadd.f32 %v830_v39, %v689_v11  ;;  %4068 = vst [vmem:[#allocation28_spill] sm:$0xff] %v3082_v56 }
  0x8d   : > { %v856_v37 = vmul.f32 %v855_v44, %v2992_v2 }
  0x8e   : > { %v846_v35 = vsel %vm845_vm0, %v2979_v58, %v844_v9  ;;  %v832_v32 = vrot.slane %v831_v8, 4  ;;  %v3077_v58 = vld [vmem:[%s2710_s16 + $0x390] sm:$0xff]  ;;  %v789_v9 = vadd.f32 %v788_v62, %v668_v27 }
  0x8f   : > { %v849_v15 = vsel %vm847_vm1, %v848_v21, %v846_v35  ;;  %v858_v16 = vsel %vm857_vm2, %v2992_v2, %v856_v37  ;;  %4067 = vst [vmem:[#allocation27_spill] sm:$0xff] %v3077_v58  ;;  %v676_v44 = vmul.f32 %v3077_v58, %v3077_v58  ;;  %v680_v2 = vmul.f32 %v3082_v56, %v3082_v56  ;;  %v3087_v37 = vld [vmem:[%s2710_s16 + $0x3d0] sm:$0xff] }
  0x90   : > { %v886_v34 = vmax.f32 %v849_v15, 1e-12  ;;  %v861_v3 = vsel %vm859_vm3, %v860_v49, %v858_v16  ;;  %v833_v21 = vadd.f32 %v832_v32, %v831_v8  ;;  %v790_v11 = vadd.f32 %v789_v9, %v672_v52  ;;  %4069 = vst [vmem:[#allocation29_spill] sm:$0xff] %v3087_v37 }
  0x91   : > { %v887_v57 = vmax.f32 %v861_v3, 1e-12  ;;  %v684_v16 = vmul.f32 %v3087_v37, %v3087_v37 }
  0x92   : > { %2308 = vrcp.f32 %v886_v34  ;;  %v834_v39 = vrot.slane %v833_v21, 2  ;;  %v791_v15 = vadd.f32 %v790_v11, %v676_v44  ;;  %v901_v3 = vand.u32 2147483648, %v886_v34 }
  0x93   : > { %2310 = vrcp.f32 %v887_v57  ;;  %vm895_vm4 = vweird.f32 %v886_v34  ;;  %v899_v62 = vand.u32 2147483647, %v886_v34  ;;  %v916_v55 = vand.u32 2147483648, %v887_v57 }
  0x94   : > { %v835_v35 = vadd.f32 %v834_v39, %v833_v21  ;;  %v792_v9 = vadd.f32 %v791_v15, %v680_v2  ;;  %v3092_v39 = vld [vmem:[%s2710_s16 + $0x3f0] sm:$0xff]  ;;  %v902_v44 = vor.u32 1.1754944e-38, %v901_v3  ;;  %vm910_vm8 = vweird.f32 %v887_v57 }
  0x95   : > { %vm900_vm7 = vcmp.eq.f32.partialorder %v899_v62, 8.507059e+37  ;;  %v917_v40 = vor.u32 1.1754944e-38, %v916_v55 }
  0x96   : > { %v836_v32 = vrot.slane %v835_v35, 1  ;;  %v793_v37 = vadd.f32 %v792_v9, %v684_v16 }
  0x98   : > { %v2309_v33 = vpop.eup %2308  ;;  %v3094_v56 = vadd.f32 %v836_v32, %v835_v35 }
  0x99   : > { %v891_v27 = vmul.f32 %v2309_v33, %v886_v34  ;;  %v2311_v49 = vpop.eup %2310  ;;  %vm896_vm5 = vweird.f32 %v2309_v33  ;;  %v688_v34 = vmul.f32 %v3092_v39, %v3092_v39 }
  0x9a   : > { %v906_v52 = vmul.f32 %v2311_v49, %v887_v57  ;;  %vm897_vm6 = vmor %vm895_vm4, %vm896_vm5  ;;  %vm911_vm9 = vweird.f32 %v2311_v49  ;;  %2312 = vrsqrt.f32 %v3094_v56 }
  0x9b   : > { %v892_v8 = vsub.f32 1.0, %v891_v27  ;;  %v914_v27 = vand.u32 2147483647, %v887_v57  ;;  %vm912_vm10 = vmor %vm910_vm8, %vm911_vm9  ;;  %v794_v55 = vadd.f32 %v793_v37, %v688_v34 }
  0x9c   : > { %v907_v11 = vsub.f32 1.0, %v906_v52 }
  0x9d   : > { %v893_v21 = vmul.f32 %v2309_v33, %v892_v8  ;;  %vm915_vm11 = vcmp.eq.f32.partialorder %v914_v27, 8.507059e+37 }
  0x9e   : > { %v908_v45 = vmul.f32 %v2311_v49, %v907_v11 }
  0x9f   : > { %v894_v58 = vadd.f32 %v2309_v33, %v893_v21 }
  0xa0   : > { %v909_v8 = vadd.f32 %v2311_v49, %v908_v45  ;;  %v3126_v37 = vpop.eup %2312 }
  0xa1   : > { %v898_v2 = vsel %vm897_vm6, %v2309_v33, %v894_v58 }
  0xa2   : > { %v3098_v15 = vsel %vm900_vm7, %v902_v44, %v898_v2  ;;  %v913_v52 = vsel %vm912_vm10, %v2311_v49, %v909_v8 }
  0xa3   : > { %v3101_v3 = vpop.xlane.xlu1 %309  ;;  %v1006_v35 = vmul.f32 %v3098_v15, %v2782_v25  ;;  %v1010_v32 = vmul.f32 %v3098_v15, %v2792_v31  ;;  %v1070_v62 = vmul.f32 %v3098_v15, %v2931_v50  ;;  %v1074_v58 = vmul.f32 %v3098_v15, %v2943_v14 }
  0xa4   : > { %2314 = vrsqrt.f32 %v3101_v3  ;;  %v3113_v45 = vpop.xlane.xlu0 %303  ;;  %v998_v31 = vmul.f32 %v3098_v15, %v2762_v13  ;;  %v3118_v50 = vsel %vm915_vm11, %v917_v40, %v913_v52  ;;  %v1002_v14 = vmul.f32 %v3098_v15, %v2772_v19 }
  0xa5   : > { %2316 = vrsqrt.f32 %v3113_v45  ;;  %v1110_v25 = vpack.c.bf16 %v1010_v32, %v1006_v35  ;;  %v1142_v33 = vpack.c.bf16 %v1074_v58, %v1070_v62  ;;  %v1062_v57 = vmul.f32 %v3098_v15, %v2907_v63 }
  0xa6   : > { %v1066_v16 = vmul.f32 %v3098_v15, %v2919_v28  ;;  %v1007_v49 = vmul.f32 %v3118_v50, %v2799_v36  ;;  %v1011_v13 = vmul.f32 %v3118_v50, %v2807_v42  ;;  %v1071_v40 = vmul.f32 %v3118_v50, %v2946_v20 }
  0xa7   : > { %1146 = vmatpush.bf16.msra.mxu0 %v1110_v25  ;;  %1165 = vmatpush.bf16.msra.mxu1 %v1142_v33  ;;  %v795_v19 = vrot.slane %v794_v55, 4  ;;  %v1075_v63 = vmul.f32 %v3118_v50, %v2955_v48  ;;  %v1106_v9 = vpack.c.bf16 %v1002_v14, %v998_v31  ;;  %v999_v28 = vmul.f32 %v3118_v50, %v2779_v24 }
  0xa8   : > { %v1138_v21 = vpack.c.bf16 %v1066_v16, %v1062_v57  ;;  %v1111_v11 = vpack.c.bf16 %v1011_v13, %v1007_v49  ;;  %v1003_v36 = vmul.f32 %v3118_v50, %v2789_v30  ;;  %v1063_v42 = vmul.f32 %v3118_v50, %v2922_v17 }
  0xa9   : > { %v1067_v20 = vmul.f32 %v3118_v50, %v2934_v38  ;;  %v1143_v2 = vpack.c.bf16 %v1075_v63, %v1071_v40  ;;  %v990_v24 = vmul.f32 %v3098_v15, %v2744_v1  ;;  %v994_v8 = vmul.f32 %v3098_v15, %v2752_v7 }
  0xaa   : > { %v2315_v44 = vpop.eup %2314  ;;  %1184 = vmatpush.bf16.msra.mxu2 %v1111_v11  ;;  %v3156_v35 = vadd.f32 %v795_v19, %v794_v55  ;;  %v348_v1 = vand.u32 2147483648, %v3101_v3  ;;  %v324_v7 = vand.u32 2147483648, %v3113_v45  ;;  %v1107_v62 = vpack.c.bf16 %v1003_v36, %v999_v28 }
  0xab   : > { %v2317_v27 = vpop.eup %2316  ;;  %v339_v34 = vmul.f32 %v2315_v44, %v3101_v3  ;;  %v3145_v48 = vpop.xlane.xlu1 %312  ;;  %1147 = vmatpush.bf16.msra.mxu0 %v1106_v9  ;;  %1203 = vmatpush.bf16.msra.mxu3 %v1143_v2  ;;  %vm321_vm12 = vcmp.eq.f32.partialorder %v3113_v45, inf  ;;  %v1139_v25 = vpack.c.bf16 %v1067_v20, %v1063_v42  ;;  %v1102_v33 = vpack.c.bf16 %v994_v8, %v990_v24 }
  0xac   : > { %v315_v30 = vmul.f32 %v2317_v27, %v3113_v45  ;;  %2318 = vrsqrt.f32 %v3145_v48  ;;  %v3153_v17 = vpop.xlane.xlu0 %306  ;;  %1166 = vmatpush.bf16.msra.mxu1 %v1138_v21  ;;  %v1054_v52 = vmul.f32 %v3098_v15, %v2883_v23  ;;  %vm345_vm13 = vcmp.eq.f32.partialorder %v3101_v3, inf }
  0xad   : > { %v340_v38 = vmul.f32 %v2315_v44, %v339_v34  ;;  %2320 = vrsqrt.f32 %v3153_v17  ;;  %vm323_vm14 = vcmp.eq.f32.partialorder %v3113_v45, 0.0  ;;  %v1058_v55 = vmul.f32 %v3098_v15, %v2895_v46 }
  0xae   : > { %v316_v32 = vmul.f32 %v2317_v27, %v315_v30  ;;  %1185 = vmatpush.bf16.msra.mxu2 %v1107_v62  ;;  %v991_v14 = vmul.f32 %v3118_v50, %v2759_v12  ;;  %v995_v57 = vmul.f32 %v3118_v50, %v2769_v18  ;;  %v1055_v23 = vmul.f32 %v3118_v50, %v2898_v47 }
  0xaf   : > { %v341_v58 = vmul.f32 0.5, %v340_v38  ;;  %1204 = vmatpush.bf16.msra.mxu3 %v1139_v25  ;;  %1148 = vmatpush.bf16.msra.mxu0 %v1102_v33  ;;  %v1059_v49 = vmul.f32 %v3118_v50, %v2910_v61  ;;  %v982_v13 = vmul.f32 %v3098_v15, %v2732_v53  ;;  %v1134_v19 = vpack.c.bf16 %v1058_v55, %v1054_v52  ;;  %v2338_v25 = vld [vmem:[%s2710_s16 + $0xc0] sm:$0xff] }
  0xb0   : > { %v317_v31 = vmul.f32 0.5, %v316_v32  ;;  %v1103_v63 = vpack.c.bf16 %v995_v57, %v991_v14  ;;  %v986_v12 = vmul.f32 %v3098_v15, %v2736_v59  ;;  %vm347_vm15 = vcmp.eq.f32.partialorder %v3101_v3, 0.0  ;;  %v2339_v52 = vld [vmem:[%s2710_s16 + $0xe0] sm:$0xff] }
  0xb1   : > { %v342_v16 = vsub.f32 1.5, %v341_v58  ;;  %v1135_v47 = vpack.c.bf16 %v1059_v49, %v1055_v23  ;;  %v1046_v61 = vmul.f32 %v3098_v15, %v2856_v51  ;;  %v360_v53 = vand.u32 2147483648, %v3145_v48  ;;  %1167 = vmatpush.bf16.msra.mxu1 %v1134_v19  ;;  %v2340_v49 = vld [vmem:[%s2710_s16 + $0xc8] sm:$0xff] }
  0xb2   : > { %v2319_v40 = vpop.eup %2318  ;;  %v318_v46 = vsub.f32 1.5, %v317_v31  ;;  %1186 = vmatpush.bf16.msra.mxu2 %v1103_v63  ;;  %v1098_v36 = vpack.c.bf16 %v986_v12, %v982_v13  ;;  %v983_v20 = vmul.f32 %v3118_v50, %v2741_v0  ;;  %v987_v34 = vmul.f32 %v3118_v50, %v2749_v6  ;;  %v2341_v19 = vld [vmem:[%s2710_s16 + $0xe8] sm:$0xff]  ;;  %v2342_v12 = vld [vmem:[%s2710_s16 + $0x80] sm:$0xff] }
  0xb3   : > { %v2321_v18 = vpop.eup %2320  ;;  %v343_v9 = vmul.f32 %v2315_v44, %v342_v16  ;;  %v351_v21 = vmul.f32 %v2319_v40, %v3145_v48  ;;  %1205 = vmatpush.bf16.msra.mxu3 %v1135_v47  ;;  %v1050_v44 = vmul.f32 %v3098_v15, %v2871_v4  ;;  %v1047_v2 = vmul.f32 %v3118_v50, %v2874_v5 }
  0xb4   : > { %v319_v28 = vmul.f32 %v2317_v27, %v318_v46  ;;  %v327_v11 = vmul.f32 %v2321_v18, %v3153_v17  ;;  %1149 = vmatpush.bf16.msra.mxu0 %v1098_v36  ;;  %vm357_vm0 = vcmp.eq.f32.partialorder %v3145_v48, inf  ;;  %vm333_vm1 = vcmp.eq.f32.partialorder %v3153_v17, inf }
  0xb5   : > { %v344_v59 = vmul.f32 %v343_v9, %v3101_v3  ;;  %v352_v42 = vmul.f32 %v2319_v40, %v351_v21  ;;  %v1130_v4 = vpack.c.bf16 %v1050_v44, %v1046_v61  ;;  %v1051_v0 = vmul.f32 %v3118_v50, %v2886_v26  ;;  %v2343_v9 = vld [vmem:[%s2710_s16 + $0xa0] sm:$0xff] }
  0xb6   : > { %v320_v51 = vmul.f32 %v319_v28, %v3113_v45  ;;  %v328_v27 = vmul.f32 %v2321_v18, %v327_v11  ;;  %vm335_vm2 = vcmp.eq.f32.partialorder %v3153_v17, 0.0  ;;  %v1099_v6 = vpack.c.bf16 %v987_v34, %v983_v20  ;;  %v4071_v61 = vld [vmem:[#allocation12_spill] sm:$0xff]  ;;  %v4072_v28 = vld [vmem:[#allocation13_spill] sm:$0xff] }
  0xb7   : > { %v353_v24 = vmul.f32 0.5, %v352_v42  ;;  %v346_v5 = vsel %vm345_vm13, %v3101_v3, %v344_v59  ;;  %1168 = vmatpush.bf16.msra.mxu1 %v1130_v4  ;;  %v1131_v26 = vpack.c.bf16 %v1051_v0, %v1047_v2  ;;  %vm359_vm3 = vcmp.eq.f32.partialorder %v3145_v48, 0.0  ;;  %v4070_v3 = vld [vmem:[#allocation16_spill] sm:$0xff]  ;;  %v2344_v34 = vld [vmem:[%s2710_s16 + $0x88] sm:$0xff] }
  0xb8   : > { %v322_v8 = vsel %vm321_vm12, %v3113_v45, %v320_v51  ;;  %v329_v30 = vmul.f32 0.5, %v328_v27  ;;  %v336_v58 = vand.u32 2147483648, %v3153_v17  ;;  %1187 = vmatpush.bf16.msra.mxu2 %v1099_v6  ;;  %v974_v33 = vmul.f32 %v2338_v25, %v3098_v15  ;;  %v2345_v4 = vld [vmem:[%s2710_s16 + $0xa8] sm:$0xff]  ;;  %v2348_v25 = vld [vmem:[%s2710_s16 + $0x240] sm:$0xff] }
  0xb9   : > { %v3208_v38 = vsel %vm323_vm14, %v324_v7, %v322_v8  ;;  %v354_v32 = vsub.f32 1.5, %v353_v24  ;;  %v978_v31 = vmul.f32 %v2339_v52, %v3098_v15  ;;  %1206 = vmatpush.bf16.msra.mxu3 %v1131_v26  ;;  %v1038_v55 = vmul.f32 %v3098_v15, %v2836_v29  ;;  %v4073_v8 = vld [vmem:[#allocation14_spill] sm:$0xff] }
  0xba   : > { %v330_v62 = vsub.f32 1.5, %v329_v30  ;;  %v3217_v45 = vmax.f32 %v3208_v38, 1e-12  ;;  %v1042_v14 = vmul.f32 %v3098_v15, %v2845_v41  ;;  %v3227_v57 = vsel %vm347_vm15, %v348_v1, %v346_v5  ;;  %v4074_v30 = vld [vmem:[#allocation15_spill] sm:$0xff] }
  0xbb   : > { %v355_v7 = vmul.f32 %v2319_v40, %v354_v32  ;;  %v1094_v23 = vpack.c.bf16 %v978_v31, %v974_v33  ;;  %v975_v13 = vmul.f32 %v2340_v49, %v3118_v50  ;;  %v979_v29 = vmul.f32 %v2341_v19, %v3118_v50  ;;  %v2346_v32 = vld [vmem:[%s2710_s16 + $0x40] sm:$0xff]  ;;  %v2353_v19 = vld [vmem:[%s2710_s16 + $0x268] sm:$0xff] }
  0xbc   : > { %v331_v16 = vmul.f32 %v2321_v18, %v330_v62  ;;  %v1126_v46 = vpack.c.bf16 %v1042_v14, %v1038_v55  ;;  %v1039_v41 = vmul.f32 %v3118_v50, %v2848_v43  ;;  %v1043_v1 = vmul.f32 %v3118_v50, %v4070_v3  ;;  %v2347_v62 = vld [vmem:[%s2710_s16 + $0x60] sm:$0xff]  ;;  %v2350_v14 = vld [vmem:[%s2710_s16 + $0x48] sm:$0xff] }
  0xbd   : > { %v356_v40 = vmul.f32 %v355_v7, %v3145_v48  ;;  %1150 = vmatpush.bf16.msra.mxu0 %v1094_v23  ;;  %v966_v18 = vmul.f32 %v2342_v12, %v3098_v15  ;;  %v970_v21 = vmul.f32 %v2343_v9, %v3098_v15  ;;  %2322 = vrcp.f32 %v3217_v45  ;;  %v2349_v31 = vld [vmem:[%s2710_s16 + $0x260] sm:$0xff]  ;;  %v2351_v23 = vld [vmem:[%s2710_s16 + $0x68] sm:$0xff] }
  0xbe   : > { %v332_v63 = vmul.f32 %v331_v16, %v3153_v17  ;;  %1169 = vmatpush.bf16.msra.mxu1 %v1126_v46  ;;  %v1095_v47 = vpack.c.bf16 %v979_v29, %v975_v13  ;;  %v1030_v43 = vmul.f32 %v3098_v15, %v4071_v61  ;;  %v1034_v11 = vmul.f32 %v3098_v15, %v4072_v28  ;;  %v2352_v13 = vld [vmem:[%s2710_s16 + $0x248] sm:$0xff] }
  0xbf   : > { %v358_v36 = vsel %vm357_vm0, %v3145_v48, %v356_v40  ;;  %v1127_v42 = vpack.c.bf16 %v1043_v1, %v1039_v41  ;;  %v1090_v44 = vpack.c.bf16 %v970_v21, %v966_v18  ;;  %v3255_v20 = vmax.f32 %v3227_v57, 1e-12  ;;  %v2354_v41 = vld [vmem:[%s2710_s16] sm:$0xff] }
  0xc0   : > { %v334_v59 = vsel %vm333_vm1, %v3153_v17, %v332_v63  ;;  %1188 = vmatpush.bf16.msra.mxu2 %v1095_v47  ;;  %v1122_v27 = vpack.c.bf16 %v1034_v11, %v1030_v43  ;;  %v967_v2 = vmul.f32 %v2344_v34, %v3118_v50  ;;  %v971_v0 = vmul.f32 %v2345_v4, %v3118_v50  ;;  %v2355_v1 = vld [vmem:[%s2710_s16 + $0x20] sm:$0xff]  ;;  %v2358_v43 = vld [vmem:[%s2710_s16 + $0x8] sm:$0xff] }
  0xc1   : > { %v3259_v51 = vsel %vm335_vm2, %v336_v58, %v334_v59  ;;  %1207 = vmatpush.bf16.msra.mxu3 %v1127_v42  ;;  %1151 = vmatpush.bf16.msra.mxu0 %v1090_v44  ;;  %v1031_v17 = vmul.f32 %v3118_v50, %v4073_v8  ;;  %v1035_v6 = vmul.f32 %v3118_v50, %v4074_v30  ;;  %v2356_v18 = vld [vmem:[%s2710_s16 + $0x200] sm:$0xff]  ;;  %v2359_v11 = vld [vmem:[%s2710_s16 + $0x28] sm:$0xff]  ;;  %vm371_vm5 = vweird.f32 %v3217_v45 }
  0xc2   : > { %v3264_v24 = vmax.f32 %v3259_v51, 1e-12  ;;  %v3276_v5 = vsel %vm359_vm3, %v360_v53, %v358_v36  ;;  %1170 = vmatpush.bf16.msra.mxu1 %v1122_v27  ;;  %v958_v26 = vmul.f32 %v2346_v32, %v3098_v15  ;;  %v962_v58 = vmul.f32 %v2347_v62, %v3098_v15  ;;  %v2357_v21 = vld [vmem:[%s2710_s16 + $0x220] sm:$0xff]  ;;  %v2360_v59 = vld [vmem:[%s2710_s16 + $0x208] sm:$0xff] }
  0xc3   : > { %v1022_v33 = vmul.f32 %v2348_v25, %v3098_v15  ;;  %v1091_v52 = vpack.c.bf16 %v971_v0, %v967_v2  ;;  %v1123_v48 = vpack.c.bf16 %v1035_v6, %v1031_v17  ;;  %v1026_v53 = vmul.f32 %v2349_v31, %v3098_v15  ;;  %v3287_v7 = vpop.eup %2322  ;;  %v2361_v34 = vld [vmem:[%s2710_s16 + $0x228] sm:$0xff] }
  0xc4   : > { %2324 = vrcp.f32 %v3264_v24  ;;  %v1086_v55 = vpack.c.bf16 %v962_v58, %v958_v26  ;;  %v959_v16 = vmul.f32 %v2350_v14, %v3118_v50  ;;  %v963_v49 = vmul.f32 %v2351_v23, %v3118_v50 }
  0xc5   : > { %v1023_v40 = vmul.f32 %v2352_v13, %v3118_v50  ;;  %2326 = vrcp.f32 %v3255_v20  ;;  %1189 = vmatpush.bf16.msra.mxu2 %v1091_v52  ;;  %1208 = vmatpush.bf16.msra.mxu3 %v1123_v48  ;;  %v1118_v46 = vpack.c.bf16 %v1026_v53, %v1022_v33  ;;  %v1027_v29 = vmul.f32 %v2353_v19, %v3118_v50 }
  0xc6   : > { %v950_v63 = vmul.f32 %v2354_v41, %v3098_v15  ;;  %1152 = vmatpush.bf16.msra.mxu0 %v1086_v55  ;;  %v1087_v3 = vpack.c.bf16 %v963_v49, %v959_v16  ;;  %v954_v12 = vmul.f32 %v2355_v1, %v3098_v15  ;;  %v1014_v9 = vmul.f32 %v2356_v18, %v3098_v15  ;;  %v2363_v18 = vld [vmem:[#allocation3 + $0x10] sm:$0xff] }
  0xc7   : > { %v1018_v47 = vmul.f32 %v2357_v21, %v3098_v15  ;;  %1171 = vmatpush.bf16.msra.mxu1 %v1118_v46  ;;  %v1119_v61 = vpack.c.bf16 %v1027_v29, %v1023_v40  ;;  %v951_v28 = vmul.f32 %v2358_v43, %v3118_v50  ;;  %v955_v36 = vmul.f32 %v2359_v11, %v3118_v50 }
  0xc8   : > { %v1015_v42 = vmul.f32 %v2360_v59, %v3118_v50  ;;  %v1082_v44 = vpack.c.bf16 %v954_v12, %v950_v63  ;;  %v1019_v2 = vmul.f32 %v2361_v34, %v3118_v50  ;;  %v367_v4 = vmul.f32 %v3287_v7, %v3217_v45 }
  0xc9   : > { %v1114_v27 = vpack.c.bf16 %v1018_v47, %v1014_v9  ;;  %v3317_v0 = vmax.f32 %v3276_v5, 1e-12  ;;  %1190 = vmatpush.bf16.msra.mxu2 %v1087_v3  ;;  %1209 = vmatpush.bf16.msra.mxu3 %v1119_v61  ;;  %v1083_v8 = vpack.c.bf16 %v955_v36, %v951_v28  ;;  %vm372_vm4 = vweird.f32 %v3287_v7  ;;  %v2364_v9 = vld [vmem:[#allocation3 + $0x8] sm:$0xff]  ;;  %v2365_v47 = vld [vmem:[#allocation3 + $0x18] sm:$0xff] }
  0xca   : > { %v2325_v15 = vpop.eup %2324  ;;  %1153 = vmatpush.bf16.msra.mxu0 %v1082_v44  ;;  %v1115_v17 = vpack.c.bf16 %v1019_v2, %v1015_v42  ;;  %v368_v30 = vsub.f32 1.0, %v367_v4  ;;  %v377_v50 = vand.u32 2147483648, %v3217_v45  ;;  %v797_v26 = vrot.slane %v3156_v35, 2  ;;  %vm373_vm7 = vmor %vm371_vm5, %vm372_vm4 }
  0xcb   : > { %v382_v6 = vmul.f32 %v2325_v15, %v3264_v24  ;;  %v3320_v32 = vpop.eup %2326  ;;  %1172 = vmatpush.bf16.msra.mxu1 %v1114_v27  ;;  %v375_v58 = vand.u32 2147483647, %v3217_v45  ;;  %v875_v33 = vmul.f32 %v3126_v37, %v3094_v56  ;;  %2328 = vrcp.f32 %v3317_v0 }
  0xcc   : > { %v369_v62 = vmul.f32 %v3287_v7, %v368_v30  ;;  %vm387_vm6 = vweird.f32 %v2325_v15  ;;  %v392_v52 = vand.u32 2147483648, %v3264_v24  ;;  %v390_v53 = vand.u32 2147483647, %v3264_v24 }
  0xcd   : > { %v383_v25 = vsub.f32 1.0, %v382_v6  ;;  %1191 = vmatpush.bf16.msra.mxu2 %v1083_v8  ;;  %1210 = vmatpush.bf16.msra.mxu3 %v1115_v17  ;;  %v876_v55 = vmul.f32 %v3126_v37, %v875_v33  ;;  %v378_v14 = vor.u32 1.1754944e-38, %v377_v50  ;;  %vm386_vm8 = vweird.f32 %v3264_v24 }
  0xce   : > { %v370_v48 = vadd.f32 %v3287_v7, %v369_v62  ;;  %v798_v16 = vadd.f32 %v797_v26, %v3156_v35  ;;  %v397_v45 = vmul.f32 %v3320_v32, %v3255_v20  ;;  %vm376_vm9 = vcmp.eq.f32.partialorder %v375_v58, 8.507059e+37  ;;  %vm388_vm10 = vmor %vm386_vm8, %vm387_vm6  ;;  %v2362_v35 = vld [vmem:[#allocation3] sm:$0xff] }
  0xcf   : > { %v384_v31 = vmul.f32 %v2325_v15, %v383_v25  ;;  %v877_v13 = vmul.f32 0.5, %v876_v55  ;;  %v393_v46 = vor.u32 1.1754944e-38, %v392_v52  ;;  %vm391_vm11 = vcmp.eq.f32.partialorder %v390_v53, 8.507059e+37 }
  0xd0   : > { %v374_v23 = vsel %vm373_vm7, %v3287_v7, %v370_v48  ;;  %v799_v19 = vrot.slane %v798_v16, 1  ;;  %v398_v63 = vsub.f32 1.0, %v397_v45  ;;  %vm881_vm12 = vcmp.eq.f32.partialorder %v3094_v56, inf }
  0xd1   : > { %v385_v49 = vadd.f32 %v2325_v15, %v384_v31  ;;  %v379_v40 = vsel %vm376_vm9, %v378_v14, %v374_v23  ;;  %v878_v41 = vsub.f32 1.5, %v877_v13  ;;  %v2329_v24 = vpop.eup %2328  ;;  %vm883_vm13 = vcmp.eq.f32.partialorder %v3094_v56, 0.0 }
  0xd2   : > { %v426_v1 = vmul.f32 %v2362_v35, %v379_v40  ;;  %v3343_v12 = vadd.f32 %v799_v19, %v798_v16  ;;  %v427_v21 = vmul.f32 %v2364_v9, %v379_v40  ;;  %v884_v28 = vand.u32 2147483648, %v3094_v56  ;;  %v2367_v16 = vld [vmem:[#allocation3 + $0x38] sm:$0xff]  ;;  %v2369_v40 = vld [vmem:[#allocation3 + $0x28] sm:$0xff] }
  0xd3   : > { %v389_v29 = vsel %vm388_vm10, %v2325_v15, %v385_v49  ;;  %v879_v43 = vmul.f32 %v3126_v37, %v878_v41  ;;  %v399_v42 = vmul.f32 %v3320_v32, %v398_v63  ;;  %v412_v44 = vmul.f32 %v2329_v24, %v3317_v0 }
  0xd4   : > { %v394_v3 = vsel %vm391_vm11, %v393_v46, %v389_v29  ;;  %2330 = vrsqrt.f32 %v3343_v12  ;;  %vm402_vm14 = vweird.f32 %v3320_v32  ;;  %v422_v15 = vand.u32 2147483648, %v3317_v0 }
  0xd5   : > { %v428_v7 = vmul.f32 %v2363_v18, %v394_v3  ;;  %v429_v61 = vmul.f32 %v2365_v47, %v394_v3  ;;  %v880_v59 = vmul.f32 %v879_v43, %v3094_v56  ;;  %v413_v34 = vsub.f32 1.0, %v412_v44 }
  0xd6   : > { %v400_v4 = vadd.f32 %v3320_v32, %v399_v42  ;;  %v407_v17 = vand.u32 2147483648, %v3255_v20  ;;  %vm417_vm15 = vweird.f32 %v2329_v24  ;;  %vm401_vm0 = vweird.f32 %v3255_v20  ;;  %v2371_v42 = vld [vmem:[%s2710_s16 + $0x1f8] sm:$0xff] }
  0xd7   : > { %v3350_v11 = vpack.c.bf16 %v428_v7, %v426_v1  ;;  %v3352_v36 = vpack.c.bf16 %v429_v61, %v427_v21  ;;  %v882_v37 = vsel %vm881_vm12, %v3094_v56, %v880_v59  ;;  %v414_v30 = vmul.f32 %v2329_v24, %v413_v34  ;;  %vm403_vm1 = vmor %vm401_vm0, %vm402_vm14 }
  0xd8   : > { %v885_v27 = vsel %vm883_vm13, %v884_v28, %v882_v37  ;;  %v420_v56 = vand.u32 2147483647, %v3317_v0  ;;  %v405_v6 = vand.u32 2147483647, %v3255_v20  ;;  %vm416_vm2 = vweird.f32 %v3317_v0  ;;  %v2366_v20 = vld [vmem:[#allocation3 + $0x30] sm:$0xff]  ;;  %v2370_v28 = vld [vmem:[%s2710_s16 + $0x1d8] sm:$0xff] }
  0xd9   : > { %1154 = vmatmul.bf16.vlgmr.msra.gmra.mxu0 %v3350_v11  ;;  %1173 = vmatmul.bf16.vlgmr.msra.gmra.mxu1 %v3352_v36  ;;  %v889_v2 = vmax.f32 %v885_v27, 1e-12  ;;  %v415_v26 = vadd.f32 %v2329_v24, %v414_v30  ;;  %v404_v62 = vsel %vm403_vm1, %v3320_v32, %v400_v4  ;;  %vm418_vm3 = vmor %vm416_vm2, %vm417_vm15  ;;  %v423_v58 = vor.u32 1.1754944e-38, %v422_v15  ;;  %v2368_v32 = vld [vmem:[#allocation3 + $0x20] sm:$0xff]  ;;  %v2373_v15 = vld [vmem:[%s2710_s16 + $0x1b8] sm:$0xff] }
  0xda   : > { %1192 = vmatmul.bf16.vlgmr.msra.gmra.mxu2 %v3350_v11  ;;  %1211 = vmatmul.bf16.vlgmr.msra.gmra.mxu3 %v3352_v36  ;;  %v2331_v8 = vpop.eup %2330  ;;  %v408_v33 = vor.u32 1.1754944e-38, %v407_v17  ;;  %vm421_vm4 = vcmp.eq.f32.partialorder %v420_v56, 8.507059e+37  ;;  %vm406_vm5 = vcmp.eq.f32.partialorder %v405_v6, 8.507059e+37  ;;  %vm869_vm8 = vcmp.eq.f32.partialorder %v3343_v12, inf  ;;  %v2374_v30 = vld [vmem:[%s2710_s16 + $0x158] sm:$0xff] }
  0xdb   : > { %2332 = vrcp.f32 %v889_v2  ;;  %v863_v50 = vmul.f32 %v2331_v8, %v3343_v12  ;;  %v419_v52 = vsel %vm418_vm3, %v2329_v24, %v415_v26  ;;  %vm940_vm6 = vweird.f32 %v889_v2  ;;  %v2375_v6 = vld [vmem:[%s2710_s16 + $0x178] sm:$0xff] }
  0xdc   : > { %v424_v48 = vsel %vm421_vm4, %v423_v58, %v419_v52  ;;  %v409_v53 = vsel %vm406_vm5, %v408_v33, %v404_v62  ;;  %v946_v0 = vand.u32 2147483648, %v889_v2  ;;  %v944_v29 = vand.u32 2147483647, %v889_v2  ;;  %v4075_v62 = vld [vmem:[#allocation21_spill] sm:$0xff] }
  0xdd   : > { %v864_v25 = vmul.f32 %v2331_v8, %v863_v50  ;;  %v432_v14 = vmul.f32 %v2366_v20, %v424_v48  ;;  %v433_v45 = vmul.f32 %v2367_v16, %v424_v48  ;;  %v430_v13 = vmul.f32 %v2368_v32, %v409_v53 }
  0xde   : > { %v431_v46 = vmul.f32 %v2369_v40, %v409_v53  ;;  %v872_v63 = vand.u32 2147483648, %v3343_v12  ;;  %vm871_vm9 = vcmp.eq.f32.partialorder %v3343_v12, 0.0  ;;  %v947_v18 = vor.u32 1.1754944e-38, %v946_v0 }
  0xdf   : > { %v865_v31 = vmul.f32 0.5, %v864_v25  ;;  %v3374_v24 = vpack.c.bf16 %v432_v14, %v430_v13  ;;  %vm945_vm11 = vcmp.eq.f32.partialorder %v944_v29, 8.507059e+37  ;;  %v4076_v25 = vld [vmem:[#allocation22_spill] sm:$0xff]  ;;  %v2378_v13 = vld [vmem:[%s2710_s16 + $0xd8] sm:$0xff] }
  0xe0   : > { %v3376_v3 = vpack.c.bf16 %v433_v45, %v431_v46  ;;  %v2379_v46 = vld [vmem:[%s2710_s16 + $0xf8] sm:$0xff] }
  0xe1   : > { %v2333_v55 = vpop.eup %2332  ;;  %v866_v49 = vsub.f32 1.5, %v865_v31  ;;  %v2377_v31 = vld [vmem:[%s2710_s16 + $0x138] sm:$0xff] }
  0xe2   : > { %v936_v23 = vmul.f32 %v2333_v55, %v889_v2  ;;  %vm941_vm7 = vweird.f32 %v2333_v55  ;;  %v2372_v2 = vld [vmem:[%s2710_s16 + $0x198] sm:$0xff] }
  0xe3   : > { %v867_v41 = vmul.f32 %v2331_v8, %v866_v49  ;;  %vm942_vm10 = vmor %vm940_vm6, %vm941_vm7 }
  0xe4   : > { %v937_v19 = vsub.f32 1.0, %v936_v23  ;;  %v4078_v23 = vld [vmem:[#allocation20_spill] sm:$0xff] }
  0xe5   : > { %v868_v1 = vmul.f32 %v867_v41, %v3343_v12 }
  0xe6   : > { %v938_v35 = vmul.f32 %v2333_v55, %v937_v19 }
  0xe7   : > { %v870_v9 = vsel %vm869_vm8, %v3343_v12, %v868_v1 }
  0xe8   : > { %v939_v7 = vadd.f32 %v2333_v55, %v938_v35  ;;  %v873_v21 = vsel %vm871_vm9, %v872_v63, %v870_v9  ;;  %v4082_v9 = vld [vmem:[#allocation18_spill] sm:$0xff] }
  0xe9   : > { %1159 = vmatmul.bf16.gmra.mxu0 %v3374_v24  ;;  %1178 = vmatmul.bf16.gmra.mxu1 %v3376_v3  ;;  %v888_v61 = vmax.f32 %v873_v21, 1e-12 }
  0xea   : > { %1197 = vmatmul.bf16.gmra.mxu2 %v3374_v24  ;;  %1216 = vmatmul.bf16.gmra.mxu3 %v3376_v3  ;;  %v943_v47 = vsel %vm942_vm10, %v2333_v55, %v939_v7  ;;  %v4077_v55 = vld [vmem:[#allocation19_spill] sm:$0xff] }
  0xeb   : > { %v3386_v43 = vsel %vm945_vm11, %v947_v18, %v943_v47  ;;  %2334 = vrcp.f32 %v888_v61  ;;  %v931_v16 = vand.u32 2147483648, %v888_v61  ;;  %vm925_vm12 = vweird.f32 %v888_v61  ;;  %v4081_v18 = vld [vmem:[#allocation17_spill] sm:$0xff]  ;;  %v2380_v47 = vld [vmem:[%s2710_s16 + $0x98] sm:$0xff] }
  0xec   : > { %v1009_v59 = vmul.f32 %v2370_v28, %v3386_v43  ;;  %v1013_v44 = vmul.f32 %v2371_v42, %v3386_v43  ;;  %v1073_v12 = vmul.f32 %v3386_v43, %v3038_v22  ;;  %v1077_v37 = vmul.f32 %v3386_v43, %v3050_v10  ;;  %v2381_v28 = vld [vmem:[%s2710_s16 + $0xb8] sm:$0xff] }
  0xed   : > { %v1001_v4 = vmul.f32 %v2372_v2, %v3386_v43  ;;  %v1005_v8 = vmul.f32 %v2373_v15, %v3386_v43  ;;  %v1065_v17 = vmul.f32 %v3386_v43, %v3024_v54  ;;  %v1069_v22 = vmul.f32 %v3386_v43, %v3030_v60  ;;  %v2376_v60 = vld [vmem:[%s2710_s16 + $0x118] sm:$0xff] }
  0xee   : > { %v1113_v27 = vpack.c.bf16 %v1013_v44, %v1009_v59  ;;  %v1145_v34 = vpack.c.bf16 %v1077_v37, %v1073_v12  ;;  %v993_v56 = vmul.f32 %v2374_v30, %v3386_v43  ;;  %v997_v50 = vmul.f32 %v2375_v6, %v3386_v43  ;;  %v2382_v12 = vld [vmem:[%s2710_s16 + $0x298] sm:$0xff] }
  0xef   : > { %v1109_v10 = vpack.c.bf16 %v1005_v8, %v1001_v4  ;;  %v1141_v26 = vpack.c.bf16 %v1069_v22, %v1065_v17  ;;  %v1057_v58 = vmul.f32 %v3386_v43, %v4075_v62  ;;  %v1061_v54 = vmul.f32 %v3386_v43, %v4076_v25  ;;  %v2384_v4 = vld [vmem:[%s2710_s16 + $0x58] sm:$0xff]  ;;  %v4083_v62 = vld [vmem:[#allocation29_spill] sm:$0xff] }
  0xf0   : > { %1260 = vmatpush.bf16.msrb.mxu2 %v1113_v27  ;;  %1279 = vmatpush.bf16.msrb.mxu3 %v1145_v34  ;;  %v1105_v52 = vpack.c.bf16 %v997_v50, %v993_v56  ;;  %v985_v48 = vmul.f32 %v2376_v60, %v3386_v43  ;;  %v989_v53 = vmul.f32 %v2377_v31, %v3386_v43  ;;  %v929_v32 = vand.u32 2147483647, %v888_v61  ;;  %v2383_v34 = vld [vmem:[%s2710_s16 + $0x2b8] sm:$0xff]  ;;  %v2386_v56 = vld [vmem:[%s2710_s16 + $0x1d0] sm:$0xff] }
  0xf1   : > { %v2335_v33 = vpop.eup %2334  ;;  %v1049_v20 = vmul.f32 %v3386_v43, %v4077_v55  ;;  %v1137_v45 = vpack.c.bf16 %v1061_v54, %v1057_v58  ;;  %v1053_v49 = vmul.f32 %v3386_v43, %v4078_v23  ;;  %v977_v40 = vmul.f32 %v2378_v13, %v3386_v43  ;;  %v2387_v50 = vld [vmem:[%s2710_s16 + $0x1f0] sm:$0xff] }
  0xf2   : > { %v921_v14 = vmul.f32 %v2335_v33, %v888_v61  ;;  %vm926_vm13 = vweird.f32 %v2335_v33  ;;  %v981_v19 = vmul.f32 %v2379_v46, %v3386_v43  ;;  %v932_v41 = vor.u32 1.1754944e-38, %v931_v16  ;;  %v2388_v54 = vld [vmem:[%s2710_s16 + $0x190] sm:$0xff]  ;;  %v2390_v16 = vld [vmem:[%s2710_s16 + $0x258] sm:$0xff] }
  0xf3   : > { %v1101_v63 = vpack.c.bf16 %v989_v53, %v985_v48  ;;  %v1133_v35 = vpack.c.bf16 %v1053_v49, %v1049_v20  ;;  %vm3424_vm14 = vmor %vm925_vm12, %vm926_vm13  ;;  %v1041_v7 = vmul.f32 %v3386_v43, %v4081_v18  ;;  %v1045_v21 = vmul.f32 %v3386_v43, %v4082_v9  ;;  %v4084_v48 = vld [vmem:[#allocation27_spill] sm:$0xff]  ;;  %v4085_v53 = vld [vmem:[#allocation28_spill] sm:$0xff] }
  0xf4   : > { %1261 = vmatpush.bf16.msrb.mxu2 %v1109_v10  ;;  %1280 = vmatpush.bf16.msrb.mxu3 %v1141_v26  ;;  %v922_v0 = vsub.f32 1.0, %v921_v14  ;;  %v969_v61 = vmul.f32 %v2380_v47, %v3386_v43  ;;  %v973_v59 = vmul.f32 %v2381_v28, %v3386_v43  ;;  %vm930_vm15 = vcmp.eq.f32.partialorder %v929_v32, 8.507059e+37  ;;  %v2385_v10 = vld [vmem:[%s2710_s16 + $0x78] sm:$0xff]  ;;  %v2393_v13 = vld [vmem:[%s2710_s16 + $0x170] sm:$0xff] }
  0xf5   : > { %v1097_v44 = vpack.c.bf16 %v981_v19, %v977_v40  ;;  %v1033_v37 = vmul.f32 %v2382_v12, %v3386_v43  ;;  %v1037_v2 = vmul.f32 %v2383_v34, %v3386_v43  ;;  %v961_v15 = vmul.f32 %v2384_v4, %v3386_v43  ;;  %v2398_v12 = vld [vmem:[%s2710_s16 + $0x130] sm:$0xff]  ;;  %v4088_v4 = vld [vmem:[#allocation23_spill] sm:$0xff] }
  0xf6   : > { %v923_v29 = vmul.f32 %v2335_v33, %v922_v0  ;;  %v1129_v17 = vpack.c.bf16 %v1045_v21, %v1041_v7  ;;  %v1093_v22 = vpack.c.bf16 %v973_v59, %v969_v61  ;;  %v965_v30 = vmul.f32 %v2385_v10, %v3386_v43  ;;  %v2392_v0 = vld [vmem:[%s2710_s16 + $0x150] sm:$0xff]  ;;  %v2394_v7 = vld [vmem:[%s2710_s16 + $0x18] sm:$0xff] }
  0xf7   : > { %v1125_v46 = vpack.c.bf16 %v1037_v2, %v1033_v37  ;;  %v953_v9 = vmul.f32 %v2394_v7, %v3386_v43  ;;  %v2395_v21 = vld [vmem:[%s2710_s16 + $0x38] sm:$0xff] }
  0xf8   : > { %1262 = vmatpush.bf16.msrb.mxu2 %v1105_v52  ;;  %1281 = vmatpush.bf16.msrb.mxu3 %v1137_v45  ;;  %v924_v42 = vadd.f32 %v2335_v33, %v923_v29  ;;  %v2389_v52 = vld [vmem:[%s2710_s16 + $0x1b0] sm:$0xff]  ;;  %v1025_v45 = vmul.f32 %v2390_v16, %v3386_v43  ;;  %v4086_v29 = vld [vmem:[#allocation25_spill] sm:$0xff]  ;;  %v1089_v1 = vpack.c.bf16 %v965_v30, %v961_v15  ;;  %v2396_v61 = vld [vmem:[%s2710_s16 + $0x218] sm:$0xff] }
  0xf9   : > { %v957_v47 = vmul.f32 %v2395_v21, %v3386_v43  ;;  %v1017_v28 = vmul.f32 %v2396_v61, %v3386_v43  ;;  %v2407_v16 = vld [vmem:[%s2710_s16 + $0x2b0] sm:$0xff] }
  0xfa   : > { %v928_v27 = vsel %vm3424_vm14, %v2335_v33, %v924_v42  ;;  %v2397_v42 = vld [vmem:[%s2710_s16 + $0x110] sm:$0xff] }
  0xfb   : > { %v3444_v8 = vsel %vm930_vm15, %v932_v41, %v928_v27  ;;  %v2399_v27 = vld [vmem:[%s2710_s16 + $0x238] sm:$0xff]  ;;  %v1085_v10 = vpack.c.bf16 %v957_v47, %v953_v9  ;;  %v2412_v9 = vld [vmem:[%s2710_s16 + $0x10] sm:$0xff] }
  0xfc   : > { %1263 = vmatpush.bf16.msrb.mxu2 %v1101_v63  ;;  %1282 = vmatpush.bf16.msrb.mxu3 %v1133_v35  ;;  %v1008_v6 = vmul.f32 %v2386_v56, %v3444_v8  ;;  %v1012_v26 = vmul.f32 %v2387_v50, %v3444_v8  ;;  %v1072_v58 = vmul.f32 %v3444_v8, %v4083_v62  ;;  %v4087_v63 = vld [vmem:[#allocation26_spill] sm:$0xff] }
  0xfd   : > { %v1076_v25 = vmul.f32 %v3444_v8, %v3092_v39  ;;  %v1000_v33 = vmul.f32 %v2388_v54, %v3444_v8  ;;  %v1004_v60 = vmul.f32 %v2389_v52, %v3444_v8  ;;  %v1064_v31 = vmul.f32 %v3444_v8, %v4084_v48  ;;  %v2391_v39 = vld [vmem:[%s2710_s16 + $0x278] sm:$0xff]  ;;  %v2400_v56 = vld [vmem:[%s2710_s16 + $0xd0] sm:$0xff] }
  0xfe   : > { %v1068_v55 = vmul.f32 %v3444_v8, %v4085_v53  ;;  %v1112_v20 = vpack.c.bf16 %v1012_v26, %v1008_v6  ;;  %v1029_v23 = vmul.f32 %v2391_v39, %v3386_v43  ;;  %v992_v32 = vmul.f32 %v2392_v0, %v3444_v8  ;;  %v2401_v6 = vld [vmem:[%s2710_s16 + $0xf0] sm:$0xff] }
  0xff   : > { %v1144_v14 = vpack.c.bf16 %v1076_v25, %v1072_v58  ;;  %v1108_v49 = vpack.c.bf16 %v1004_v60, %v1000_v33  ;;  %v996_v40 = vmul.f32 %v2393_v13, %v3444_v8  ;;  %v1056_v41 = vmul.f32 %v3444_v8, %v4086_v29  ;;  %v2402_v58 = vld [vmem:[%s2710_s16 + $0x2d0] sm:$0xff] }
 0x100   : > { %1264 = vmatpush.bf16.msrb.mxu2 %v1097_v44  ;;  %1283 = vmatpush.bf16.msrb.mxu3 %v1129_v17  ;;  %v1140_v19 = vpack.c.bf16 %v1068_v55, %v1064_v31  ;;  %v1060_v35 = vmul.f32 %v3444_v8, %v4087_v63  ;;  %v1121_v18 = vpack.c.bf16 %v1029_v23, %v1025_v45  ;;  %v4089_v17 = vld [vmem:[#allocation24_spill] sm:$0xff]  ;;  %v2403_v54 = vld [vmem:[%s2710_s16 + $0x2f0] sm:$0xff] }
 0x101   : > { %1222 = vmatpush.bf16.msrb.mxu0 %v1112_v20  ;;  %1241 = vmatpush.bf16.msrb.mxu1 %v1144_v14  ;;  %v1104_v59 = vpack.c.bf16 %v996_v40, %v992_v32  ;;  %v984_v44 = vmul.f32 %v2397_v42, %v3444_v8  ;;  %v988_v37 = vmul.f32 %v2398_v12, %v3444_v8  ;;  %v2404_v52 = vld [vmem:[%s2710_s16 + $0x90] sm:$0xff]  ;;  %v1854_v40 = vstv %s1853_s24  ;;  %s1983_s24 = sshll.u32 %s3644_s14, 4  ;;  %s1984_s24 = int_to_ptr.vmem [resolvable:$true] %s1983_s24 }
 0x102   : > { %v1021_v34 = vmul.f32 %v2399_v27, %v3386_v43  ;;  %v1136_v2 = vpack.c.bf16 %v1060_v35, %v1056_v41  ;;  %v1048_v15 = vmul.f32 %v3444_v8, %v4088_v4  ;;  %v976_v43 = vmul.f32 %v2400_v56, %v3444_v8  ;;  %v2405_v48 = vld [vmem:[%s2710_s16 + $0xb0] sm:$0xff]  ;;  %v1810_v35 = vld [vmem:[%s4022_s2] sm:$0xff]  ;;  %v1811_v4 = vld [vmem:[%s4022_s2 + $0x8] sm:$0xff] }
 0x103   : > { %v1100_v30 = vpack.c.bf16 %v988_v37, %v984_v44  ;;  %v980_v50 = vmul.f32 %v2401_v6, %v3444_v8  ;;  %v1040_v25 = vmul.f32 %v2402_v58, %v3444_v8  ;;  %v1044_v33 = vmul.f32 %v2403_v54, %v3444_v8  ;;  %v2406_v53 = vld [vmem:[%s2710_s16 + $0x290] sm:$0xff] }
 0x104   : > { %1265 = vmatpush.bf16.msrb.mxu2 %v1093_v22  ;;  %1284 = vmatpush.bf16.msrb.mxu3 %v1125_v46  ;;  %v1052_v22 = vmul.f32 %v3444_v8, %v4089_v17  ;;  %v1117_v26 = vpack.c.bf16 %v1021_v34, %v1017_v28  ;;  %v968_v60 = vmul.f32 %v2404_v52, %v3444_v8  ;;  %v2408_v23 = vld [vmem:[%s2710_s16 + $0x50] sm:$0xff]  ;;  %2336 = vrcp.f32 %v1854_v40 }
 0x105   : > { %1223 = vmatpush.bf16.msrb.mxu0 %v1108_v49  ;;  %1242 = vmatpush.bf16.msrb.mxu1 %v1140_v19  ;;  %v972_v31 = vmul.f32 %v2405_v48, %v3444_v8  ;;  %v1032_v55 = vmul.f32 %v2406_v53, %v3444_v8  ;;  %v1096_v20 = vpack.c.bf16 %v980_v50, %v976_v43  ;;  %v2409_v0 = vld [vmem:[%s2710_s16 + $0x70] sm:$0xff]  ;;  %vm1860_vm0 = vweird.f32 %v1854_v40 }
 0x106   : > { %v1132_v62 = vpack.c.bf16 %v1052_v22, %v1048_v15  ;;  %v1128_v14 = vpack.c.bf16 %v1044_v33, %v1040_v25  ;;  %v1036_v45 = vmul.f32 %v2407_v16, %v3444_v8  ;;  %v960_v49 = vmul.f32 %v2408_v23, %v3444_v8  ;;  %v1812_v13 = vld [vmem:[%s4022_s2 + $0x10] sm:$0xff] }
 0x107   : > { %v1092_v39 = vpack.c.bf16 %v972_v31, %v968_v60  ;;  %v964_v32 = vmul.f32 %v2409_v0, %v3444_v8  ;;  %v2410_v19 = vld [vmem:[%s2710_s16 + $0x250] sm:$0xff]  ;;  %v952_v21 = vmul.f32 %v2412_v9, %v3444_v8  ;;  %v1866_v15 = vand.u32 2147483648, %v1854_v40 }
 0x108   : > { %1266 = vmatpush.bf16.msrb.mxu2 %v1089_v1  ;;  %1285 = vmatpush.bf16.msrb.mxu3 %v1121_v18  ;;  %v1124_v46 = vpack.c.bf16 %v1036_v45, %v1032_v55  ;;  %v1024_v29 = vmul.f32 %v2410_v19, %v3444_v8  ;;  %v2411_v41 = vld [vmem:[%s2710_s16 + $0x270] sm:$0xff]  ;;  %v1813_v1 = vld [vmem:[%s4022_s2 + $0x18] sm:$0xff]  ;;  %v2570_v18 = vmov 0   ;;  %v1864_v22 = vand.u32 2147483647, %v1854_v40 }
 0x109   : > { %1224 = vmatpush.bf16.msrb.mxu0 %v1104_v59  ;;  %1243 = vmatpush.bf16.msrb.mxu1 %v1136_v2  ;;  %v1028_v63 = vmul.f32 %v2411_v41, %v3444_v8  ;;  %v1088_v7 = vpack.c.bf16 %v964_v32, %v960_v49  ;;  %v2413_v47 = vld [vmem:[%s2710_s16 + $0x30] sm:$0xff] }
 0x10a   : > { %2302 = vset.pattern.permute.xlu0 %v2570_v18  ;;  %2303 = vset.pattern.permute.xlu1 %v2570_v18  ;;  %v956_v61 = vmul.f32 %v2413_v47, %v3444_v8  ;;  %v2414_v59 = vld [vmem:[%s2710_s16 + $0x210] sm:$0xff]  ;;  %v2337_v37 = vpop.eup %2336  ;;  %vm1865_vm3 = vcmp.eq.f32.partialorder %v1864_v22, 8.507059e+37 }
 0x10b   : > { %1831 = vperm.xlu0 %2302, %v1812_v13   ;;  %2301 = vset.pattern.permute.xlu2 %v2570_v18  ;;  %v1120_v28 = vpack.c.bf16 %v1028_v63, %v1024_v29  ;;  %v1016_v42 = vmul.f32 %v2414_v59, %v3444_v8  ;;  %v2415_v44 = vld [vmem:[%s2710_s16 + $0x230] sm:$0xff]  ;;  %v1856_v27 = vmul.f32 %v2337_v37, %v1854_v40  ;;  %vm1861_vm1 = vweird.f32 %v2337_v37 }
 0x10c   : > { %1267 = vmatpush.bf16.msrb.mxu2 %v1085_v10  ;;  %1286 = vmatpush.bf16.msrb.mxu3 %v1117_v26  ;;  %v1020_v12 = vmul.f32 %v2415_v44, %v3444_v8  ;;  %v1084_v34 = vpack.c.bf16 %v956_v61, %v952_v21  ;;  %vm1862_vm2 = vmor %vm1860_vm0, %vm1861_vm1  ;;  %v1867_v8 = vor.u32 1.1754944e-38, %v1866_v15 }
 0x10d   : > { %1225 = vmatpush.bf16.msrb.mxu0 %v1100_v30  ;;  %1244 = vmatpush.bf16.msrb.mxu1 %v1132_v62  ;;  %v1857_v17 = vsub.f32 1.0, %v1856_v27 }
 0x10e   : > { %1825 = vperm.xlu2 %2301, %v1810_v35   ;;  %1834 = vperm.xlu1 %2303, %v1813_v1   ;;  %v1116_v2 = vpack.c.bf16 %v1020_v12, %v1016_v42 }
 0x10f   : > { %1268 = vmatmul.bf16.vlgmr.msrb.gmra.mxu2 %v3350_v11  ;;  %1287 = vmatmul.bf16.vlgmr.msrb.gmra.mxu3 %v3352_v36  ;;  %v1858_v10 = vmul.f32 %v2337_v37, %v1857_v17 }
 0x111   : > { %1226 = vmatpush.bf16.msrb.mxu0 %v1096_v20  ;;  %1245 = vmatpush.bf16.msrb.mxu1 %v1128_v14  ;;  %v1859_v30 = vadd.f32 %v2337_v37, %v1858_v10 }
 0x113   : > { %v1863_v56 = vsel %vm1862_vm2, %v2337_v37, %v1859_v30 }
 0x114   : > { %v1868_v43 = vsel %vm1865_vm3, %v1867_v8, %v1863_v56 }
 0x115   : > { %1227 = vmatpush.bf16.msrb.mxu0 %v1092_v39  ;;  %1246 = vmatpush.bf16.msrb.mxu1 %v1124_v46  ;;  %2216 = vpush %v1868_v43 }
 0x116   : > { %1828 = vperm.xlu2 %2301, %v1811_v4  }
 0x119   : > { %1228 = vmatpush.bf16.msrb.mxu0 %v1088_v7  ;;  %1247 = vmatpush.bf16.msrb.mxu1 %v1120_v28 }
 0x11d   : > { %1229 = vmatpush.bf16.msrb.mxu0 %v1084_v34  ;;  %1248 = vmatpush.bf16.msrb.mxu1 %v1116_v2 }
 0x11f   : > { %1273 = vmatmul.bf16.gmra.mxu2 %v3374_v24  ;;  %1292 = vmatmul.bf16.gmra.mxu3 %v3376_v3 }
 0x120   : > { %1230 = vmatmul.bf16.vlgmr.msrb.gmra.mxu0 %v3350_v11  ;;  %1249 = vmatmul.bf16.vlgmr.msrb.gmra.mxu1 %v3352_v36 }
 0x130   : > { %1235 = vmatmul.bf16.gmra.mxu0 %v3374_v24  ;;  %1254 = vmatmul.bf16.gmra.mxu1 %v3376_v3  ;;  %v2571_v24 = vmov 0.0  }
 0x146   : > { %s2217_s25 = spop %2216 }
 0x147   : > { %v3583_v27 = vstv %s2217_s25 }
 0x156   : > { %v1155_v6 = vpop.f32.mrf.mxu0  ;;  %v1174_v50 = vpop.f32.mrf.mxu1 }
 0x157   : > { %v1175_v26 = vadd.f32 %v1174_v50, %v1155_v6 }
 0x159   : > { %v3547_v25 = vclamps-f32 %v1175_v26, 1.0 }
 0x15b   : > { %v1330_v11 = vmul.f32 %v3547_v25, %v3547_v25  ;;  %vm1410_vm4 = vcmp.le.f32.partialorder %v3547_v25, 0.70710677  ;;  %vm1474_vm5 = vcmp.le.f32.partialorder %v3547_v25, 1.7948966e-09  ;;  %vm1538_vm6 = vcmp.le.f32.partialorder %v3547_v25, -0.70710677 }
 0x15c   : > { %v2145_v3 = vsel %vm1410_vm4, 1.0, %v2571_v24  ;;  %v2161_v60 = vsel %vm1474_vm5, 1.0, %v2571_v24  ;;  %v2177_v14 = vsel %vm1538_vm6, 1.0, %v2571_v24  ;;  %vm1602_vm7 = vcmp.le.f32.partialorder %v3547_v25, -1.0 }
 0x15d   : > { %v1193_v62 = vpop.f32.mrf.mxu2  ;;  %v1212_v58 = vpop.f32.mrf.mxu3  ;;  %v1346_v31 = vmul.f32 8.0, %v1330_v11  ;;  %v1522_v53 = vadd.f32 %v2161_v60, %v2145_v3  ;;  %v2193_v19 = vsel %vm1602_vm7, 1.0, %v2571_v24 }
 0x15e   : > { %v1157_v54 = vpop.f32.mrf.mxu0  ;;  %v1176_v33 = vpop.f32.mrf.mxu1  ;;  %v1213_v52 = vadd.f32 %v1212_v58, %v1193_v62 }
 0x15f   : > { %v1177_v36 = vadd.f32 %v1176_v33, %v1157_v54  ;;  %v1586_v45 = vadd.f32 %v2177_v14, %v1522_v53  ;;  %v2129_v0 = vadd.f32 -8.0, %v1346_v31 }
 0x160   : > { %v3556_v48 = vclamps-f32 %v1213_v52, 1.0 }
 0x161   : > { %v3559_v16 = vclamps-f32 %v1177_v36, 1.0  ;;  %v1650_v63 = vadd.f32 %v2193_v19, %v1586_v45  ;;  %v1378_v1 = vmul.f32 %v2129_v0, %v1330_v11  ;;  %v1814_v45 = vlaneseq }
 0x162   : > { %v1331_v49 = vmul.f32 %v3556_v48, %v3556_v48  ;;  %vm1411_vm8 = vcmp.le.f32.partialorder %v3556_v48, 0.70710677  ;;  %vm1475_vm9 = vcmp.le.f32.partialorder %v3556_v48, 1.7948966e-09  ;;  %vm1539_vm10 = vcmp.le.f32.partialorder %v3556_v48, -0.70710677 }
 0x163   : > { %v2146_v13 = vsel %vm1411_vm8, 1.0, %v2571_v24  ;;  %v2162_v40 = vsel %vm1475_vm9, 1.0, %v2571_v24  ;;  %v2178_v41 = vsel %vm1539_vm10, 1.0, %v2571_v24  ;;  %vm1603_vm11 = vcmp.le.f32.partialorder %v3556_v48, -1.0 }
 0x164   : > { %v1523_v46 = vadd.f32 %v2162_v40, %v2146_v13  ;;  %v1347_v35 = vmul.f32 8.0, %v1331_v49  ;;  %vm1414_vm12 = vcmp.le.f32.partialorder %v3559_v16, 0.70710677  ;;  %v1666_v9 = vmul.f32 0.5, %v1650_v63 }
 0x165   : > { %v1195_v55 = vpop.f32.mrf.mxu2  ;;  %v1214_v20 = vpop.f32.mrf.mxu3  ;;  %v1334_v21 = vmul.f32 %v3559_v16, %v3559_v16  ;;  %v2194_v47 = vsel %vm1603_vm11, 1.0, %v2571_v24  ;;  %vm1478_vm13 = vcmp.le.f32.partialorder %v3559_v16, 1.7948966e-09  ;;  %v2149_v59 = vsel %vm1414_vm12, 1.0, %v2571_v24 }
 0x166   : > { %v1160_v39 = vpop.f32.mrf.mxu0  ;;  %v1179_v23 = vpop.f32.mrf.mxu1  ;;  %v1215_v32 = vadd.f32 %v1214_v20, %v1195_v55  ;;  %v1587_v18 = vadd.f32 %v2178_v41, %v1523_v46  ;;  %v1682_v28 = vfloor.f32 %v1666_v9  ;;  %v2165_v42 = vsel %vm1478_vm13, 1.0, %v2571_v24 }
 0x167   : > { %v1180_v29 = vadd.f32 %v1179_v23, %v1160_v39  ;;  %v2130_v34 = vadd.f32 -8.0, %v1347_v35  ;;  %v1394_v2 = vadd.f32 1.0, %v1378_v1  ;;  %v1350_v22 = vmul.f32 8.0, %v1334_v21 }
 0x168   : > { %v3573_v7 = vclamps-f32 %v1215_v32, 1.0  ;;  %v1651_v61 = vadd.f32 %v2194_v47, %v1587_v18  ;;  %v1698_v15 = vmul.f32 2.0, %v1682_v28  ;;  %v1526_v10 = vadd.f32 %v2165_v42, %v2149_v59  ;;  %v3613_v42 = vpop.permute.xlu2 %1825 }
 0x169   : > { %v3581_v44 = vclamps-f32 %v1180_v29, 1.0  ;;  %vm1542_vm0 = vcmp.le.f32.partialorder %v3559_v16, -0.70710677  ;;  %vm1606_vm1 = vcmp.le.f32.partialorder %v3559_v16, -1.0  ;;  %v1379_v26 = vmul.f32 %v2130_v34, %v1331_v49 }
 0x16a   : > { %v1667_v4 = vmul.f32 0.5, %v1651_v61  ;;  %v1335_v17 = vmul.f32 %v3573_v7, %v3573_v7  ;;  %vm1415_vm14 = vcmp.le.f32.partialorder %v3573_v7, 0.70710677  ;;  %vm1479_vm15 = vcmp.le.f32.partialorder %v3573_v7, 1.7948966e-09 }
 0x16b   : > { %v1714_v56 = vsub.f32 %v1650_v63, %v1698_v15  ;;  %v2150_v6 = vsel %vm1415_vm14, 1.0, %v2571_v24  ;;  %v2166_v50 = vsel %vm1479_vm15, 1.0, %v2571_v24  ;;  %vm1543_vm2 = vcmp.le.f32.partialorder %v3573_v7, -0.70710677 }
 0x16c   : > { %v1683_v30 = vfloor.f32 %v1667_v4  ;;  %v1351_v43 = vmul.f32 8.0, %v1335_v17  ;;  %v2181_v54 = vsel %vm1542_vm0, 1.0, %v2571_v24  ;;  %v2133_v33 = vadd.f32 -8.0, %v1350_v22 }
 0x16d   : > { %v1198_v12 = vpop.f32.mrf.mxu2  ;;  %v1217_v37 = vpop.f32.mrf.mxu3  ;;  %v1730_v58 = vmul.f32 2.0, %v1714_v56  ;;  %v1527_v52 = vadd.f32 %v2166_v50, %v2150_v6  ;;  %v1590_v11 = vadd.f32 %v2181_v54, %v1526_v10  ;;  %vm1607_vm3 = vcmp.le.f32.partialorder %v3573_v7, -1.0 }
 0x16e   : > { %v1218_v8 = vadd.f32 %v1217_v37, %v1198_v12  ;;  %v1699_v62 = vmul.f32 2.0, %v1683_v30  ;;  %v2182_v60 = vsel %vm1543_vm2, 1.0, %v2571_v24  ;;  %v2197_v31 = vsel %vm1606_vm1, 1.0, %v2571_v24 }
 0x16f   : > { %v1746_v3 = vsub.f32 1.0, %v1730_v58  ;;  %v1778_v53 = vmul.f32 2.0, %v1650_v63  ;;  %v2134_v55 = vadd.f32 -8.0, %v1351_v43  ;;  %v1591_v20 = vadd.f32 %v2182_v60, %v1527_v52 }
 0x170   : > { %v1715_v36 = vsub.f32 %v1651_v61, %v1699_v62  ;;  %v1654_v14 = vadd.f32 %v2197_v31, %v1590_v11  ;;  %v2198_v49 = vsel %vm1607_vm3, 1.0, %v2571_v24  ;;  %v3602_v0 = vclamps-f32 %v1218_v8, 1.0  ;;  %v1162_v31 = vpop.f32.mrf.mxu0 }
 0x171   : > { %v1762_v23 = vmul.f32 %v1746_v3, %v1394_v2  ;;  %v1395_v32 = vadd.f32 1.0, %v1379_v26  ;;  %v1655_v13 = vadd.f32 %v2198_v49, %v1591_v20  ;;  %v3604_v46 = vand.u32 127, %v1814_v45 }
 0x172   : > { %v1731_v39 = vmul.f32 2.0, %v1715_v36  ;;  %v1670_v40 = vmul.f32 0.5, %v1654_v14  ;;  %v1382_v41 = vmul.f32 %v2133_v33, %v1334_v21  ;;  %v3606_v63 = vstv %s2112_s8 }
 0x173   : > { %v1794_v29 = vsub.f32 %v1762_v23, %v1778_v53  ;;  %v1383_v35 = vmul.f32 %v2134_v55, %v1335_v17  ;;  %v1671_v1 = vmul.f32 0.5, %v1655_v13  ;;  %v3610_v9 = vadd.s32 %v3606_v63, %v3604_v46  ;;  %v1181_v53 = vpop.f32.mrf.mxu1 }
 0x174   : > { %v1747_v19 = vsub.f32 1.0, %v1731_v39  ;;  %v1686_v18 = vfloor.f32 %v1670_v40  ;;  %v1779_v28 = vmul.f32 2.0, %v1651_v61  ;;  %v1398_v2 = vadd.f32 1.0, %v1382_v41 }
 0x175   : > { %v1870_v59 = vsub.f32 %v1794_v29, %v3547_v25  ;;  %v1687_v12 = vfloor.f32 %v1671_v1  ;;  %v3618_v4 = vmul.f32 %v3581_v44, %v3581_v44  ;;  %v1816_v15 = vadd.s32 128, %v3604_v46  ;;  %v1200_v55 = vpop.f32.mrf.mxu2  ;;  %v1219_v23 = vpop.f32.mrf.mxu3 }
 0x176   : > { %v1763_v47 = vmul.f32 %v1747_v19, %v1395_v32  ;;  %v1702_v37 = vmul.f32 2.0, %v1686_v18  ;;  %vm1836_vm4 = vcmp.eq.s32.totalorder %v3610_v9, %v3613_v42  ;;  %v1399_v61 = vadd.f32 1.0, %v1383_v35  ;;  %v3662_v1 = vpop.permute.xlu2 %1828 }
 0x177   : > { %v1887_v21 = vmul.f32 %v3583_v27, %v1870_v59  ;;  %v3626_v17 = vmul.f32 %v3602_v0, %v3602_v0  ;;  %v1703_v8 = vmul.f32 2.0, %v1687_v12  ;;  %v3631_v56 = vadd.s32 %v3606_v63, %v1816_v15 }
 0x178   : > { %v1795_v34 = vsub.f32 %v1763_v47, %v1779_v28  ;;  %v1718_v30 = vsub.f32 %v1654_v14, %v1702_v37  ;;  %v1782_v43 = vmul.f32 2.0, %v1654_v14  ;;  %vm1418_vm5 = vcmp.le.f32.partialorder %v3581_v44, 0.70710677 }
 0x179   : > { %v1903_v10 = vadd.f32 %v3547_v25, %v1887_v21  ;;  %vm1419_vm6 = vcmp.le.f32.partialorder %v3602_v0, 0.70710677  ;;  %v1719_v26 = vsub.f32 %v1655_v13, %v1703_v8  ;;  %v1783_v54 = vmul.f32 2.0, %v1655_v13 }
 0x17a   : > { %v1871_v22 = vsub.f32 %v1795_v34, %v3556_v48  ;;  %v1734_v62 = vmul.f32 2.0, %v1718_v30  ;;  %v1354_v33 = vmul.f32 8.0, %v3618_v4  ;;  %v1355_v52 = vmul.f32 8.0, %v3626_v17 }
 0x17b   : > { %v1919_v50 = vsel %vm1836_vm4, %v1903_v10, %v3547_v25  ;;  %v1735_v36 = vmul.f32 2.0, %v1719_v26  ;;  %v2153_v60 = vsel %vm1418_vm5, 1.0, %v2571_v24  ;;  %vm1837_vm7 = vcmp.eq.s32.totalorder %v3631_v56, %v3613_v42 }
 0x17c   : > { %v1888_v6 = vmul.f32 %v3583_v27, %v1871_v22  ;;  %v1935_v58 = vmul.f32 %v1919_v50, %v3208_v38  ;;  %v1750_v3 = vsub.f32 1.0, %v1734_v62  ;;  %v2154_v25 = vsel %vm1419_vm6, 1.0, %v2571_v24 }
 0x17d   : > { %vm1482_vm8 = vcmp.le.f32.partialorder %v3581_v44, 1.7948966e-09  ;;  %vm1483_vm9 = vcmp.le.f32.partialorder %v3602_v0, 1.7948966e-09  ;;  %v1751_v14 = vsub.f32 1.0, %v1735_v36  ;;  %v1182_v41 = vadd.f32 %v1181_v53, %v1162_v31 }
 0x17e   : > { %v1904_v11 = vadd.f32 %v3556_v48, %v1888_v6  ;;  %1951 = vst [vmem:[%s3644_s14] sm:$0xff] %v1935_v58  ;;  %v1766_v45 = vmul.f32 %v1750_v3, %v1398_v2  ;;  %v2169_v39 = vsel %vm1482_vm8, 1.0, %v2571_v24  ;;  %v2170_v32 = vsel %vm1483_vm9, 1.0, %v2571_v24 }
 0x17f   : > { %v1530_v13 = vadd.f32 %v2169_v39, %v2153_v60  ;;  %vm1546_vm10 = vcmp.le.f32.partialorder %v3581_v44, -0.70710677  ;;  %v1767_v40 = vmul.f32 %v1751_v14, %v1399_v61  ;;  %v1531_v29 = vadd.f32 %v2170_v32, %v2154_v25 }
 0x180   : > { %v1920_v20 = vsel %vm1837_vm7, %v1904_v11, %v3556_v48  ;;  %v1798_v19 = vsub.f32 %v1766_v45, %v1782_v43  ;;  %vm1547_vm11 = vcmp.le.f32.partialorder %v3602_v0, -0.70710677  ;;  %v2185_v48 = vsel %vm1546_vm10, 1.0, %v2571_v24 }
 0x181   : > { %v1936_v49 = vmul.f32 %v1920_v20, %v3208_v38  ;;  %v2186_v35 = vsel %vm1547_vm11, 1.0, %v2571_v24  ;;  %vm1610_vm12 = vcmp.le.f32.partialorder %v3581_v44, -1.0  ;;  %v1799_v18 = vsub.f32 %v1767_v40, %v1783_v54 }
 0x182   : > { %v1874_v47 = vsub.f32 %v1798_v19, %v3559_v16  ;;  %v1594_v28 = vadd.f32 %v2185_v48, %v1530_v13  ;;  %v1595_v59 = vadd.f32 %v2186_v35, %v1531_v29  ;;  %v2137_v12 = vadd.f32 -8.0, %v1354_v33 }
 0x183   : > { %1952 = vst [vmem:[%s3644_s14 + $0x8] sm:$0xff] %v1936_v49  ;;  %v2138_v37 = vadd.f32 -8.0, %v1355_v52  ;;  %vm1611_vm13 = vcmp.le.f32.partialorder %v3602_v0, -1.0  ;;  %v2201_v34 = vsel %vm1610_vm12, 1.0, %v2571_v24  ;;  %v1875_v21 = vsub.f32 %v1799_v18, %v3573_v7 }
 0x184   : > { %v1891_v2 = vmul.f32 %v3583_v27, %v1874_v47  ;;  %v2202_v15 = vsel %vm1611_vm13, 1.0, %v2571_v24  ;;  %v1658_v61 = vadd.f32 %v2201_v34, %v1594_v28  ;;  %v3670_v22 = vclamps-f32 %v1182_v41, 1.0 }
 0x185   : > { %v1220_v10 = vadd.f32 %v1219_v23, %v1200_v55  ;;  %vm1840_vm14 = vcmp.eq.s32.totalorder %v3610_v9, %v3662_v1  ;;  %v3674_v8 = vadd.f32 %v2202_v15, %v1595_v59  ;;  %v1817_v30 = vadd.s32 256, %v3604_v46 }
 0x186   : > { %v1892_v43 = vmul.f32 %v3583_v27, %v1875_v21  ;;  %v1907_v6 = vadd.f32 %v3559_v16, %v1891_v2  ;;  %v1674_v50 = vmul.f32 0.5, %v1658_v61  ;;  %v1818_v26 = vadd.s32 384, %v3604_v46 }
 0x187   : > { %vm1841_vm15 = vcmp.eq.s32.totalorder %v3631_v56, %v3662_v1  ;;  %v1386_v62 = vmul.f32 %v2137_v12, %v3618_v4  ;;  %v1675_v58 = vmul.f32 0.5, %v3674_v8  ;;  %v1387_v11 = vmul.f32 %v2138_v37, %v3626_v17 }
 0x188   : > { %v1908_v33 = vadd.f32 %v3573_v7, %v1892_v43  ;;  %v1923_v52 = vsel %vm1840_vm14, %v1907_v6, %v3559_v16  ;;  %v1690_v36 = vfloor.f32 %v1674_v50  ;;  %v3687_v3 = vclamps-f32 %v1220_v10, 1.0 }
 0x189   : > { %v1939_v60 = vmul.f32 %v1923_v52, %v3259_v51  ;;  %v1691_v31 = vfloor.f32 %v1675_v58  ;;  %v3692_v55 = vadd.s32 %v3606_v63, %v1817_v30  ;;  %v3698_v17 = vmul.f32 %v3670_v22, %v3670_v22 }
 0x18a   : > { %v1924_v4 = vsel %vm1841_vm15, %v1908_v33, %v3573_v7  ;;  %v1706_v53 = vmul.f32 2.0, %v1690_v36  ;;  %v3701_v14 = vadd.s32 %v3606_v63, %v1818_v26  ;;  %v1402_v39 = vadd.f32 1.0, %v1386_v62 }
 0x18b   : > { %v1940_v20 = vmul.f32 %v1924_v4, %v3259_v51  ;;  %1955 = vst [vmem:[%s3644_s14 + $0x20] sm:$0xff] %v1939_v60  ;;  %v1707_v16 = vmul.f32 2.0, %v1691_v31  ;;  %v3705_v23 = vadd.f32 1.0, %v1387_v11  ;;  %v3711_v32 = vmul.f32 %v3687_v3, %v3687_v3 }
 0x18c   : > { %v1722_v7 = vsub.f32 %v1658_v61, %v1706_v53  ;;  %vm1422_vm0 = vcmp.le.f32.partialorder %v3670_v22, 0.70710677  ;;  %v1358_v19 = vmul.f32 8.0, %v3698_v17  ;;  %vm1423_vm4 = vcmp.le.f32.partialorder %v3687_v3, 0.70710677 }
 0x18d   : > { %1956 = vst [vmem:[%s3644_s14 + $0x28] sm:$0xff] %v1940_v20  ;;  %v1723_v49 = vsub.f32 %v3674_v8, %v1707_v16  ;;  %v3724_v35 = vmul.f32 2.0, %v1658_v61  ;;  %v1359_v28 = vmul.f32 8.0, %v3711_v32  ;;  %vm1486_vm6 = vcmp.le.f32.partialorder %v3670_v22, 1.7948966e-09 }
 0x18e   : > { %vm1487_vm7 = vcmp.le.f32.partialorder %v3687_v3, 1.7948966e-09  ;;  %v1738_v37 = vmul.f32 2.0, %v1722_v7  ;;  %v2157_v15 = vsel %vm1422_vm0, 1.0, %v2571_v24  ;;  %v2158_v61 = vsel %vm1423_vm4, 1.0, %v2571_v24 }
 0x18f   : > { %v1739_v34 = vmul.f32 2.0, %v1723_v49  ;;  %v2173_v50 = vsel %vm1486_vm6, 1.0, %v2571_v24  ;;  %v2174_v26 = vsel %vm1487_vm7, 1.0, %v2571_v24  ;;  %v3742_v58 = vmul.f32 2.0, %v3674_v8 }
 0x190   : > { %v3746_v33 = vadd.f32 -8.0, %v1359_v28  ;;  %v1754_v36 = vsub.f32 1.0, %v1738_v37  ;;  %v3754_v4 = vadd.f32 %v2174_v26, %v2158_v61  ;;  %vm1839_vm0 = vcmp.eq.s32.totalorder %v3701_v14, %v3613_v42 }
 0x191   : > { %vm1838_vm7 = vcmp.eq.s32.totalorder %v3692_v55, %v3613_v42 }
 0x192   : > { %v1269_v54 = vpop.f32.mrf.mxu2  ;;  %v1288_v46 = vpop.f32.mrf.mxu3  ;;  %v1770_v49 = vmul.f32 %v1754_v36, %v1402_v39 }
 0x193   : > { %v1289_v25 = vadd.f32 %v1288_v46, %v1269_v54  ;;  %v3744_v54 = vadd.f32 -8.0, %v1358_v19  ;;  %v1755_v46 = vsub.f32 1.0, %v1739_v34 }
 0x195   : > { %v3703_v45 = vclamps-f32 %v1289_v25, 1.0  ;;  %v3752_v25 = vadd.f32 %v2173_v50, %v2157_v15 }
 0x197   : > { %v1333_v13 = vmul.f32 %v3703_v45, %v3703_v45  ;;  %vm1413_vm1 = vcmp.le.f32.partialorder %v3703_v45, 0.70710677  ;;  %vm1477_vm2 = vcmp.le.f32.partialorder %v3703_v45, 1.7948966e-09  ;;  %vm1541_vm3 = vcmp.le.f32.partialorder %v3703_v45, -0.70710677 }
 0x198   : > { %v2148_v63 = vsel %vm1413_vm1, 1.0, %v2571_v24  ;;  %v2164_v40 = vsel %vm1477_vm2, 1.0, %v2571_v24  ;;  %vm1605_vm5 = vcmp.le.f32.partialorder %v3703_v45, -1.0  ;;  %v2180_v18 = vsel %vm1541_vm3, 1.0, %v2571_v24 }
 0x199   : > { %v1349_v29 = vmul.f32 8.0, %v1333_v13  ;;  %v1525_v41 = vadd.f32 %v2164_v40, %v2148_v63  ;;  %v2196_v2 = vsel %vm1605_vm5, 1.0, %v2571_v24 }
 0x19a   : > { %v1271_v48 = vpop.f32.mrf.mxu2  ;;  %v1290_v47 = vpop.f32.mrf.mxu3 }
 0x19b   : > { %v1589_v59 = vadd.f32 %v2180_v18, %v1525_v41  ;;  %v1291_v12 = vadd.f32 %v1290_v47, %v1271_v48  ;;  %v2132_v21 = vadd.f32 -8.0, %v1349_v29 }
 0x19d   : > { %v1231_v10 = vpop.f32.mrf.mxu0  ;;  %v1250_v30 = vpop.f32.mrf.mxu1  ;;  %v1653_v43 = vadd.f32 %v2196_v2, %v1589_v59  ;;  %v3737_v6 = vclamps-f32 %v1291_v12, 1.0  ;;  %v1381_v31 = vmul.f32 %v2132_v21, %v1333_v13  ;;  %v1771_v21 = vmul.f32 %v1755_v46, %v3705_v23 }
 0x19e   : > { %v1251_v62 = vadd.f32 %v1250_v30, %v1231_v10 }
 0x19f   : > { %v1669_v52 = vmul.f32 0.5, %v1653_v43  ;;  %v1337_v11 = vmul.f32 %v3737_v6, %v3737_v6  ;;  %vm1417_vm8 = vcmp.le.f32.partialorder %v3737_v6, 0.70710677  ;;  %vm1481_vm9 = vcmp.le.f32.partialorder %v3737_v6, 1.7948966e-09 }
 0x1a0   : > { %v3750_v60 = vclamps-f32 %v1251_v62, 1.0  ;;  %vm1609_vm13 = vcmp.le.f32.partialorder %v3737_v6, -1.0  ;;  %v2152_v18 = vsel %vm1417_vm8, 1.0, %v2571_v24  ;;  %v2168_v47 = vsel %vm1481_vm9, 1.0, %v2571_v24 }
 0x1a1   : > { %v1685_v53 = vfloor.f32 %v1669_v52  ;;  %v1353_v8 = vmul.f32 8.0, %v1337_v11  ;;  %v1397_v34 = vadd.f32 1.0, %v1381_v31  ;;  %vm1545_vm15 = vcmp.le.f32.partialorder %v3737_v6, -0.70710677 }
 0x1a2   : > { %v1332_v20 = vmul.f32 %v3750_v60, %v3750_v60  ;;  %vm1412_vm10 = vcmp.le.f32.partialorder %v3750_v60, 0.70710677  ;;  %vm1476_vm11 = vcmp.le.f32.partialorder %v3750_v60, 1.7948966e-09  ;;  %vm1540_vm12 = vcmp.le.f32.partialorder %v3750_v60, -0.70710677 }
 0x1a3   : > { %v2147_v16 = vsel %vm1412_vm10, 1.0, %v2571_v24  ;;  %v2163_v7 = vsel %vm1476_vm11, 1.0, %v2571_v24  ;;  %vm1604_vm14 = vcmp.le.f32.partialorder %v3750_v60, -1.0  ;;  %v1701_v40 = vmul.f32 2.0, %v1685_v53 }
 0x1a4   : > { %v1348_v13 = vmul.f32 8.0, %v1332_v20  ;;  %v1524_v63 = vadd.f32 %v2163_v7, %v2147_v16  ;;  %v2179_v19 = vsel %vm1540_vm12, 1.0, %v2571_v24  ;;  %v2136_v48 = vadd.f32 -8.0, %v1353_v8 }
 0x1a5   : > { %v1233_v29 = vpop.f32.mrf.mxu0  ;;  %v1252_v41 = vpop.f32.mrf.mxu1  ;;  %v1717_v59 = vsub.f32 %v1653_v43, %v1701_v40  ;;  %v2195_v37 = vsel %vm1604_vm14, 1.0, %v2571_v24  ;;  %v1781_v61 = vmul.f32 2.0, %v1653_v43  ;;  %v1529_v50 = vadd.f32 %v2168_v47, %v2152_v18 }
 0x1a6   : > { %v2131_v28 = vadd.f32 -8.0, %v1348_v13  ;;  %v1588_v39 = vadd.f32 %v2179_v19, %v1524_v63  ;;  %v1253_v12 = vadd.f32 %v1252_v41, %v1233_v29  ;;  %v1385_v30 = vmul.f32 %v2136_v48, %v1337_v11  ;;  %v3797_v47 = vpop.permute.xlu0 %1831 }
 0x1a7   : > { %v1733_v15 = vmul.f32 2.0, %v1717_v59  ;;  %v2200_v26 = vsel %vm1609_vm13, 1.0, %v2571_v24  ;;  %v1802_v62 = vsub.f32 %v1770_v49, %v3724_v35  ;;  %v2184_v53 = vsel %vm1545_vm15, 1.0, %v2571_v24 }
 0x1a8   : > { %v1652_v2 = vadd.f32 %v2195_v37, %v1588_v39  ;;  %v3777_v10 = vclamps-f32 %v1253_v12, 1.0  ;;  %v1380_v52 = vmul.f32 %v2131_v28, %v1332_v20  ;;  %v1803_v49 = vsub.f32 %v1771_v21, %v3742_v58 }
 0x1a9   : > { %v1749_v31 = vsub.f32 1.0, %v1733_v15  ;;  %v1593_v19 = vadd.f32 %v2184_v53, %v1529_v50  ;;  %v1878_v18 = vsub.f32 %v1802_v62, %v3581_v44  ;;  %vm1844_vm5 = vcmp.eq.s32.totalorder %v3610_v9, %v3797_v47 }
 0x1aa   : > { %v1668_v36 = vmul.f32 0.5, %v1652_v2  ;;  %v1336_v23 = vmul.f32 %v3777_v10, %v3777_v10  ;;  %vm1416_vm1 = vcmp.le.f32.partialorder %v3777_v10, 0.70710677  ;;  %vm1480_vm2 = vcmp.le.f32.partialorder %v3777_v10, 1.7948966e-09 }
 0x1ab   : > { %vm1544_vm3 = vcmp.le.f32.partialorder %v3777_v10, -0.70710677  ;;  %v1765_v11 = vmul.f32 %v1749_v31, %v1397_v34  ;;  %v2151_v35 = vsel %vm1416_vm1, 1.0, %v2571_v24  ;;  %v2167_v46 = vsel %vm1480_vm2, 1.0, %v2571_v24 }
 0x1ac   : > { %v1684_v43 = vfloor.f32 %v1668_v36  ;;  %v1352_v8 = vmul.f32 8.0, %v1336_v23  ;;  %v1528_v20 = vadd.f32 %v2167_v46, %v2151_v35  ;;  %vm1608_vm4 = vcmp.le.f32.partialorder %v3777_v10, -1.0 }
 0x1ad   : > { %v1236_v16 = vpop.f32.mrf.mxu0  ;;  %v1255_v7 = vpop.f32.mrf.mxu1  ;;  %v1797_v63 = vsub.f32 %v1765_v11, %v1781_v61  ;;  %v2183_v40 = vsel %vm1544_vm3, 1.0, %v2571_v24  ;;  %v2199_v59 = vsel %vm1608_vm4, 1.0, %v2571_v24  ;;  %v1657_v12 = vadd.f32 %v2200_v26, %v1593_v19 }
 0x1ae   : > { %v1700_v13 = vmul.f32 2.0, %v1684_v43  ;;  %v2135_v29 = vadd.f32 -8.0, %v1352_v8  ;;  %v1592_v41 = vadd.f32 %v2183_v40, %v1528_v20  ;;  %v1256_v48 = vadd.f32 %v1255_v7, %v1236_v16 }
 0x1af   : > { %v1873_v39 = vsub.f32 %v1797_v63, %v3703_v45  ;;  %v1396_v37 = vadd.f32 1.0, %v1380_v52  ;;  %v1401_v34 = vadd.f32 1.0, %v1385_v30  ;;  %v1780_v61 = vmul.f32 2.0, %v1652_v2 }
 0x1b0   : > { %v1716_v28 = vsub.f32 %v1652_v2, %v1700_v13  ;;  %v1656_v58 = vadd.f32 %v2199_v59, %v1592_v41  ;;  %v3801_v21 = vclamps-f32 %v1256_v48, 1.0  ;;  %v1673_v36 = vmul.f32 0.5, %v1657_v12 }
 0x1b1   : > { %v1890_v50 = vmul.f32 %v3583_v27, %v1873_v39  ;;  %v1384_v62 = vmul.f32 %v2135_v29, %v1336_v23  ;;  %v1879_v53 = vsub.f32 %v1803_v49, %v3602_v0  ;;  %v1895_v43 = vmul.f32 %v3583_v27, %v1878_v18 }
 0x1b2   : > { %v1732_v15 = vmul.f32 2.0, %v1716_v28  ;;  %v1672_v31 = vmul.f32 0.5, %v1656_v58  ;;  %v1689_v30 = vfloor.f32 %v1673_v36  ;;  %vm1420_vm6 = vcmp.le.f32.partialorder %v3801_v21, 0.70710677 }
 0x1b3   : > { %v1906_v52 = vadd.f32 %v3703_v45, %v1890_v50  ;;  %v1340_v11 = vmul.f32 %v3801_v21, %v3801_v21  ;;  %v2155_v23 = vsel %vm1420_vm6, 1.0, %v2571_v24  ;;  %vm1484_vm8 = vcmp.le.f32.partialorder %v3801_v21, 1.7948966e-09 }
 0x1b4   : > { %v1748_v26 = vsub.f32 1.0, %v1732_v15  ;;  %v1688_v2 = vfloor.f32 %v1672_v31  ;;  %v1705_v8 = vmul.f32 2.0, %v1689_v30  ;;  %v2171_v20 = vsel %vm1484_vm8, 1.0, %v2571_v24  ;;  %v1274_v31 = vpop.f32.mrf.mxu2 }
 0x1b5   : > { %v1922_v46 = vsel %vm1839_vm0, %v1906_v52, %v3703_v45  ;;  %v1532_v49 = vadd.f32 %v2171_v20, %v2155_v23  ;;  %v1896_v13 = vmul.f32 %v3583_v27, %v1879_v53  ;;  %vm1548_vm9 = vcmp.le.f32.partialorder %v3801_v21, -0.70710677  ;;  %v1293_v53 = vpop.f32.mrf.mxu3  ;;  %v1257_v23 = vpop.f32.mrf.mxu1 }
 0x1b6   : > { %v1764_v35 = vmul.f32 %v1748_v26, %v1396_v37  ;;  %v1938_v16 = vmul.f32 %v1922_v46, %v3208_v38  ;;  %v1704_v7 = vmul.f32 2.0, %v1688_v2  ;;  %v1721_v40 = vsub.f32 %v1657_v12, %v1705_v8  ;;  %v1238_v2 = vpop.f32.mrf.mxu0 }
 0x1b7   : > { %vm1612_vm10 = vcmp.le.f32.partialorder %v3801_v21, -1.0  ;;  %v1785_v29 = vmul.f32 2.0, %v1657_v12  ;;  %v1356_v41 = vmul.f32 8.0, %v1340_v11  ;;  %v2187_v45 = vsel %vm1548_vm9, 1.0, %v2571_v24 }
 0x1b8   : > { %v1796_v63 = vsub.f32 %v1764_v35, %v1780_v61  ;;  %1954 = vst [vmem:[%s3644_s14 + $0x18] sm:$0xff] %v1938_v16  ;;  %v1720_v19 = vsub.f32 %v1656_v58, %v1704_v7  ;;  %v1737_v18 = vmul.f32 2.0, %v1721_v40  ;;  %v1596_v28 = vadd.f32 %v2187_v45, %v1532_v49 }
 0x1b9   : > { %v1911_v39 = vadd.f32 %v3581_v44, %v1895_v43  ;;  %v2203_v37 = vsel %vm1612_vm10, 1.0, %v2571_v24  ;;  %v1912_v15 = vadd.f32 %v3602_v0, %v1896_v13  ;;  %vm1845_vm11 = vcmp.eq.s32.totalorder %v3631_v56, %v3797_v47 }
 0x1ba   : > { %v1872_v48 = vsub.f32 %v1796_v63, %v3750_v60  ;;  %v1736_v59 = vmul.f32 2.0, %v1720_v19  ;;  %v1400_v12 = vadd.f32 1.0, %v1384_v62  ;;  %v1753_v50 = vsub.f32 1.0, %v1737_v18 }
 0x1bb   : > { %v3834_v36 = vadd.f32 %v2203_v37, %v1596_v28  ;;  %v1784_v52 = vmul.f32 2.0, %v1656_v58  ;;  %v1927_v43 = vsel %vm1844_vm5, %v1911_v39, %v3581_v44  ;;  %v1928_v30 = vsel %vm1845_vm11, %v1912_v15, %v3602_v0 }
 0x1bc   : > { %v1889_v61 = vmul.f32 %v3583_v27, %v1872_v48  ;;  %v1752_v26 = vsub.f32 1.0, %v1736_v59  ;;  %vm1842_vm12 = vcmp.eq.s32.totalorder %v3692_v55, %v3662_v1  ;;  %v1769_v62 = vmul.f32 %v1753_v50, %v1401_v34 }
 0x1bd   : > { %v2139_v46 = vadd.f32 -8.0, %v1356_v41  ;;  %v1676_v8 = vmul.f32 0.5, %v3834_v36  ;;  %v1943_v20 = vmul.f32 %v1927_v43, %v3227_v57  ;;  %v1944_v16 = vmul.f32 %v1928_v30, %v3227_v57 }
 0x1be   : > { %v1905_v35 = vadd.f32 %v3750_v60, %v1889_v61  ;;  %v1768_v58 = vmul.f32 %v1752_v26, %v1400_v12  ;;  %v1294_v44 = vadd.f32 %v1293_v53, %v1274_v31  ;;  %v1801_v7 = vsub.f32 %v1769_v62, %v1785_v29 }
 0x1bf   : > { %v1692_v49 = vfloor.f32 %v1676_v8  ;;  %v1258_v34 = vadd.f32 %v1257_v23, %v1238_v2  ;;  %vm1550_vm13 = vcmp.le.f32.partialorder %v3670_v22, -0.70710677  ;;  %vm1551_vm14 = vcmp.le.f32.partialorder %v3687_v3, -0.70710677  ;;  %1959 = vst [vmem:[%s3644_s14 + $0x40] sm:$0xff] %v1943_v20 }
 0x1c0   : > { %v1921_v0 = vsel %vm1838_vm7, %v1905_v35, %v3750_v60  ;;  %v1800_v63 = vsub.f32 %v1768_v58, %v1784_v52  ;;  %vm1843_vm15 = vcmp.eq.s32.totalorder %v3701_v14, %v3662_v1  ;;  %v3857_v40 = vclamps-f32 %v1294_v44, 1.0  ;;  %1960 = vst [vmem:[%s3644_s14 + $0x48] sm:$0xff] %v1944_v16 }
 0x1c1   : > { %v1937_v13 = vmul.f32 %v1921_v0, %v3208_v38  ;;  %v1877_v42 = vsub.f32 %v1801_v7, %v3737_v6  ;;  %v1388_v60 = vmul.f32 %v2139_v46, %v1340_v11  ;;  %v1708_v19 = vmul.f32 2.0, %v1692_v49 }
 0x1c2   : > { %v3861_v29 = vclamps-f32 %v1258_v34, 1.0  ;;  %v1876_v41 = vsub.f32 %v1800_v63, %v3777_v10  ;;  %v1341_v38 = vmul.f32 %v3857_v40, %v3857_v40  ;;  %vm1421_vm0 = vcmp.le.f32.partialorder %v3857_v40, 0.70710677 }
 0x1c3   : > { %1953 = vst [vmem:[%s3644_s14 + $0x10] sm:$0xff] %v1937_v13  ;;  %vm1485_vm1 = vcmp.le.f32.partialorder %v3857_v40, 1.7948966e-09  ;;  %v1894_v45 = vmul.f32 %v3583_v27, %v1877_v42  ;;  %v1724_v48 = vsub.f32 %v3834_v36, %v1708_v19  ;;  %v2156_v11 = vsel %vm1421_vm0, 1.0, %v2571_v24 }
 0x1c4   : > { %v2172_v18 = vsel %vm1485_vm1, 1.0, %v2571_v24  ;;  %v1893_v28 = vmul.f32 %v3583_v27, %v1876_v41  ;;  %v1357_v39 = vmul.f32 8.0, %v1341_v38  ;;  %vm1549_vm2 = vcmp.le.f32.partialorder %v3857_v40, -0.70710677 }
 0x1c5   : > { %v1533_v59 = vadd.f32 %v2172_v18, %v2156_v11  ;;  %v1910_v37 = vadd.f32 %v3737_v6, %v1894_v45  ;;  %v1740_v15 = vmul.f32 2.0, %v1724_v48  ;;  %v2188_v61 = vsel %vm1549_vm2, 1.0, %v2571_v24 }
 0x1c6   : > { %vm1613_vm3 = vcmp.le.f32.partialorder %v3857_v40, -1.0  ;;  %v1909_v12 = vadd.f32 %v3777_v10, %v1893_v28  ;;  %v1404_v50 = vadd.f32 1.0, %v1388_v60  ;;  %v1344_v43 = vmul.f32 %v3861_v29, %v3861_v29 }
 0x1c7   : > { %v1597_v31 = vadd.f32 %v2188_v61, %v1533_v59  ;;  %v2204_v53 = vsel %vm1613_vm3, 1.0, %v2571_v24  ;;  %v1926_v26 = vsel %vm1843_vm15, %v1910_v37, %v3737_v6  ;;  %v1756_v52 = vsub.f32 1.0, %v1740_v15  ;;  %v1276_v61 = vpop.f32.mrf.mxu2 }
 0x1c8   : > { %vm1424_vm4 = vcmp.le.f32.partialorder %v3861_v29, 0.70710677  ;;  %v1925_v30 = vsel %vm1842_vm12, %v1909_v12, %v3777_v10  ;;  %v1942_v2 = vmul.f32 %v1926_v26, %v3259_v51  ;;  %vm1846_vm5 = vcmp.eq.s32.totalorder %v3692_v55, %v3797_v47  ;;  %v1295_v12 = vpop.f32.mrf.mxu3 }
 0x1c9   : > { %v2140_v23 = vadd.f32 -8.0, %v1357_v39  ;;  %v1661_v35 = vadd.f32 %v2204_v53, %v1597_v31  ;;  %v1941_v6 = vmul.f32 %v1925_v30, %v3259_v51  ;;  %v1772_v62 = vmul.f32 %v1756_v52, %v1404_v50 }
 0x1ca   : > { %v1788_v46 = vmul.f32 2.0, %v3834_v36  ;;  %v2159_v8 = vsel %vm1424_vm4, 1.0, %v2571_v24  ;;  %1958 = vst [vmem:[%s3644_s14 + $0x38] sm:$0xff] %v1942_v2  ;;  %vm1488_vm6 = vcmp.le.f32.partialorder %v3861_v29, 1.7948966e-09  ;;  %v2189_v1 = vsel %vm1550_vm13, 1.0, %v2571_v24 }
 0x1cb   : > { %v1677_v58 = vmul.f32 0.5, %v1661_v35  ;;  %v2190_v10 = vsel %vm1551_vm14, 1.0, %v2571_v24  ;;  %1957 = vst [vmem:[%s3644_s14 + $0x30] sm:$0xff] %v1941_v6  ;;  %v1360_v51 = vmul.f32 8.0, %v1344_v43  ;;  %v2175_v16 = vsel %vm1488_vm6, 1.0, %v2571_v24 }
 0x1cc   : > { %v1804_v20 = vsub.f32 %v1772_v62, %v1788_v46  ;;  %vm1552_vm7 = vcmp.le.f32.partialorder %v3861_v29, -0.70710677  ;;  %v1389_v36 = vmul.f32 %v2140_v23, %v1341_v38  ;;  %v1536_v0 = vadd.f32 %v2175_v16, %v2159_v8 }
 0x1cd   : > { %v1693_v44 = vfloor.f32 %v1677_v58  ;;  %v1598_v7 = vadd.f32 %v2189_v1, %v3752_v25  ;;  %v2191_v34 = vsel %vm1552_vm7, 1.0, %v2571_v24  ;;  %v1599_v13 = vadd.f32 %v2190_v10, %v3754_v4 }
 0x1ce   : > { %v1880_v49 = vsub.f32 %v1804_v20, %v3801_v21  ;;  %vm1614_vm8 = vcmp.le.f32.partialorder %v3670_v22, -1.0  ;;  %v1600_v42 = vadd.f32 %v2191_v34, %v1536_v0  ;;  %vm1615_vm9 = vcmp.le.f32.partialorder %v3687_v3, -1.0 }
 0x1cf   : > { %v1709_v63 = vmul.f32 2.0, %v1693_v44  ;;  %vm1616_vm10 = vcmp.le.f32.partialorder %v3861_v29, -1.0  ;;  %v2143_v19 = vadd.f32 -8.0, %v1360_v51  ;;  %v2205_v41 = vsel %vm1614_vm8, 1.0, %v2571_v24 }
 0x1d0   : > { %v1897_v60 = vmul.f32 %v3583_v27, %v1880_v49  ;;  %v2206_v25 = vsel %vm1615_vm9, 1.0, %v2571_v24  ;;  %v2207_v45 = vsel %vm1616_vm10, 1.0, %v2571_v24  ;;  %v1662_v48 = vadd.f32 %v2205_v41, %v1598_v7 }
 0x1d1   : > { %v1725_v38 = vsub.f32 %v1661_v35, %v1709_v63  ;;  %v1663_v4 = vadd.f32 %v2206_v25, %v1599_v13  ;;  %v1390_v18 = vmul.f32 %v3744_v54, %v3698_v17  ;;  %v1664_v28 = vadd.f32 %v2207_v45, %v1600_v42 }
 0x1d2   : > { %v1913_v11 = vadd.f32 %v3801_v21, %v1897_v60  ;;  %v1391_v59 = vmul.f32 %v3746_v33, %v3711_v32  ;;  %v1678_v37 = vmul.f32 0.5, %v1662_v48  ;;  %v1405_v31 = vadd.f32 1.0, %v1389_v36 }
 0x1d3   : > { %v1741_v39 = vmul.f32 2.0, %v1725_v38  ;;  %v1679_v15 = vmul.f32 0.5, %v1663_v4  ;;  %v1392_v53 = vmul.f32 %v2143_v19, %v1344_v43  ;;  %v1680_v26 = vmul.f32 0.5, %v1664_v28 }
 0x1d4   : > { %v1929_v50 = vsel %vm1846_vm5, %v1913_v11, %v3801_v21  ;;  %v1694_v52 = vfloor.f32 %v1678_v37  ;;  %v1406_v2 = vadd.f32 1.0, %v1390_v18  ;;  %v1296_v33 = vadd.f32 %v1295_v12, %v1276_v61 }
 0x1d5   : > { %v1945_v17 = vmul.f32 %v1929_v50, %v3227_v57  ;;  %v1757_v54 = vsub.f32 1.0, %v1741_v39  ;;  %v1695_v30 = vfloor.f32 %v1679_v15  ;;  %v1696_v32 = vfloor.f32 %v1680_v26 }
 0x1d6   : > { %v1789_v6 = vmul.f32 2.0, %v1661_v35  ;;  %v1710_v62 = vmul.f32 2.0, %v1694_v52  ;;  %vm1847_vm11 = vcmp.eq.s32.totalorder %v3701_v14, %v3797_v47  ;;  %v1407_v21 = vadd.f32 1.0, %v1391_v59 }
 0x1d7   : > { %1961 = vst [vmem:[%s3644_s14 + $0x50] sm:$0xff] %v1945_v17  ;;  %v1773_v23 = vmul.f32 %v1757_v54, %v1405_v31  ;;  %v1711_v46 = vmul.f32 2.0, %v1695_v30  ;;  %v1712_v8 = vmul.f32 2.0, %v1696_v32  ;;  %v3932_v43 = vclamps-f32 %v1296_v33, 1.0 }
 0x1d8   : > { %v1408_v1 = vadd.f32 1.0, %v1392_v53  ;;  %v1726_v10 = vsub.f32 %v1662_v48, %v1710_v62  ;;  %v1790_v16 = vmul.f32 2.0, %v1662_v48  ;;  %v1791_v41 = vmul.f32 2.0, %v1663_v4  ;;  %v1835_v53 = vpop.permute.xlu1 %1834 }
 0x1d9   : > { %v1805_v58 = vsub.f32 %v1773_v23, %v1789_v6  ;;  %v1727_v20 = vsub.f32 %v1663_v4, %v1711_v46  ;;  %v1728_v51 = vsub.f32 %v1664_v28, %v1712_v8  ;;  %vm1425_vm12 = vcmp.le.f32.partialorder %v3932_v43, 0.70710677 }
 0x1da   : > { %vm1489_vm13 = vcmp.le.f32.partialorder %v3932_v43, 1.7948966e-09  ;;  %v1742_v36 = vmul.f32 2.0, %v1726_v10  ;;  %v2160_v0 = vsel %vm1425_vm12, 1.0, %v2571_v24  ;;  %v1345_v49 = vmul.f32 %v3932_v43, %v3932_v43 }
 0x1db   : > { %v1881_v35 = vsub.f32 %v1805_v58, %v3857_v40  ;;  %v1743_v44 = vmul.f32 2.0, %v1727_v20  ;;  %v1744_v7 = vmul.f32 2.0, %v1728_v51  ;;  %v2176_v34 = vsel %vm1489_vm13, 1.0, %v2571_v24 }
 0x1dc   : > { %vm1553_vm14 = vcmp.le.f32.partialorder %v3932_v43, -0.70710677  ;;  %v1758_v63 = vsub.f32 1.0, %v1742_v36  ;;  %v1537_v60 = vadd.f32 %v2176_v34, %v2160_v0  ;;  %vm1617_vm15 = vcmp.le.f32.partialorder %v3932_v43, -1.0 }
 0x1dd   : > { %v1898_v13 = vmul.f32 %v3583_v27, %v1881_v35  ;;  %v1759_v42 = vsub.f32 1.0, %v1743_v44  ;;  %v1760_v19 = vsub.f32 1.0, %v1744_v7  ;;  %v2192_v25 = vsel %vm1553_vm14, 1.0, %v2571_v24 }
 0x1de   : > { %v1774_v45 = vmul.f32 %v1758_v63, %v1406_v2  ;;  %v1601_v11 = vadd.f32 %v2192_v25, %v1537_v60  ;;  %v1792_v39 = vmul.f32 2.0, %v1664_v28  ;;  %v1361_v59 = vmul.f32 8.0, %v1345_v49 }
 0x1df   : > { %v1914_v38 = vadd.f32 %v3857_v40, %v1898_v13  ;;  %v1775_v48 = vmul.f32 %v1759_v42, %v1407_v21  ;;  %v1776_v18 = vmul.f32 %v1760_v19, %v1408_v1  ;;  %v2208_v37 = vsel %vm1617_vm15, 1.0, %v2571_v24 }
 0x1e0   : > { %v1806_v15 = vsub.f32 %v1774_v45, %v1790_v16  ;;  %v1665_v12 = vadd.f32 %v2208_v37, %v1601_v11  ;;  %vm1848_vm0 = vcmp.eq.s32.totalorder %v3610_v9, %v1835_v53  ;;  %vm1849_vm1 = vcmp.eq.s32.totalorder %v3631_v56, %v1835_v53 }
 0x1e1   : > { %v1930_v4 = vsel %vm1847_vm11, %v1914_v38, %v3857_v40  ;;  %v1807_v61 = vsub.f32 %v1775_v48, %v1791_v41  ;;  %v1808_v31 = vsub.f32 %v1776_v18, %v1792_v39  ;;  %v2144_v40 = vadd.f32 -8.0, %v1361_v59 }
 0x1e2   : > { %v1946_v50 = vmul.f32 %v1930_v4, %v3227_v57  ;;  %v1882_v26 = vsub.f32 %v1806_v15, %v3670_v22  ;;  %v1681_v28 = vmul.f32 0.5, %v1665_v12  ;;  %vm1850_vm2 = vcmp.eq.s32.totalorder %v3692_v55, %v1835_v53 }
 0x1e3   : > { %v1883_v17 = vsub.f32 %v1807_v61, %v3687_v3  ;;  %v1884_v24 = vsub.f32 %v1808_v31, %v3861_v29  ;;  %v1393_v56 = vmul.f32 %v2144_v40, %v1345_v49  ;;  %vm1851_vm3 = vcmp.eq.s32.totalorder %v3701_v14, %v1835_v53 }
 0x1e4   : > { %1962 = vst [vmem:[%s3644_s14 + $0x58] sm:$0xff] %v1946_v50  ;;  %v1899_v54 = vmul.f32 %v3583_v27, %v1882_v26  ;;  %v1697_v52 = vfloor.f32 %v1681_v28 }
 0x1e5   : > { %v1900_v47 = vmul.f32 %v3583_v27, %v1883_v17  ;;  %v1901_v57 = vmul.f32 %v3583_v27, %v1884_v24  ;;  %v1409_v58 = vadd.f32 1.0, %v1393_v56 }
 0x1e6   : > { %v1915_v30 = vadd.f32 %v3670_v22, %v1899_v54  ;;  %v1713_v32 = vmul.f32 2.0, %v1697_v52 }
 0x1e7   : > { %v1916_v2 = vadd.f32 %v3687_v3, %v1900_v47  ;;  %v1917_v33 = vadd.f32 %v3861_v29, %v1901_v57 }
 0x1e8   : > { %v1931_v23 = vsel %vm1848_vm0, %v1915_v30, %v3670_v22  ;;  %v1729_v6 = vsub.f32 %v1665_v12, %v1713_v32 }
 0x1e9   : > { %v1932_v9 = vsel %vm1849_vm1, %v1916_v2, %v3687_v3  ;;  %v1933_v62 = vsel %vm1850_vm2, %v1917_v33, %v3861_v29  ;;  %v1947_v46 = vmul.f32 %v1931_v23, %v3276_v5  ;;  %v1793_v3 = vmul.f32 2.0, %v1665_v12 }
 0x1ea   : > { %v1948_v55 = vmul.f32 %v1932_v9, %v3276_v5  ;;  %v1949_v21 = vmul.f32 %v1933_v62, %v3276_v5  ;;  %v1745_v8 = vmul.f32 2.0, %v1729_v6 }
 0x1eb   : > { %1963 = vst [vmem:[%s3644_s14 + $0x60] sm:$0xff] %v1947_v46 }
 0x1ec   : > { %1964 = vst [vmem:[%s3644_s14 + $0x68] sm:$0xff] %v1948_v55  ;;  %v1761_v1 = vsub.f32 1.0, %v1745_v8 }
 0x1ed   : > { %1965 = vst [vmem:[%s3644_s14 + $0x70] sm:$0xff] %v1949_v21 }
 0x1ee   : > { %v1777_v22 = vmul.f32 %v1761_v1, %v1409_v58 }
 0x1f0   : > { %v1809_v10 = vsub.f32 %v1777_v22, %v1793_v3 }
 0x1f2   : > { %v1885_v29 = vsub.f32 %v1809_v10, %v3932_v43 }
 0x1f4   : > { %v1902_v20 = vmul.f32 %v3583_v27, %v1885_v29 }
 0x1f6   : > { %v1918_v51 = vadd.f32 %v3932_v43, %v1902_v20 }
 0x1f8   : > { %v1934_v16 = vsel %vm1851_vm3, %v1918_v51, %v3932_v43 }
 0x1f9   : > { %v1950_v35 = vmul.f32 %v1934_v16, %v3276_v5 }
 0x1fb   : > { %1966 = vst [vmem:[%s3644_s14 + $0x78] sm:$0xff] %v1950_v35 }
 0x1fc   : > { %2503 = shalt.err (!%p2500_p0)
}
 0x1fd   : > { %s2572_s11 = smov 512   ;;  %s2573_s25 = smov 1024  }
 0x1fe   : > { %s2574_s8 = smov 32  }
 0x1ff   : > { %2224 = dma.vmem_to_hbm [thread:$0]  (%p2682_p5), %s1984_s24, 2048, %s1986_s26, %s1968_s20, %s2572_s11, %s2573_s25, %s2574_s8  }
 0x200 PF: > { %s2000_s9 = sand.u32 1, %s2542_s17   ;;  %p2235_p3 = pnand %p2104_p11, %p2652_p6 }
 0x201   : > { %s2001_s14 = scalar_lea.sflag [#allocation5], %s2000_s9 }
 0x202   : > { %p2236_p7 = pneg %p2235_p3 }
 0x204   : > { %2537 = dma.done.wait (%p2236_p7), %s2001_s14, 2048  }
 0x205   : > { %2539 = vsyncadd (%p2236_p7), %s2001_s14, 4294965248  ;;  %s22_s22 = sadd.s32 1, %s2562_s22   ;;  %s4090_s17 = smov %s2546_s18 }
 0x206   : > { %p19_p9 = scmp.ge.s32.totalorder %s22_s22, 4   ;;  %s4091_s18 = smov %s2550_s19 }
 0x207   : > { %s4092_s19 = smov %s2691_s3  ;;  %s4093_s20 = smov %s2558_s21 }
 0x208   : > { %s4094_s21 = smov %s4096_s10  ;;  %21 = sbr.rel (!%p19_p9) target bundleno = 10 (0xa), region = 90 }
 0x20d   :  { %2007 = vsyncpa [#allocation4], 1 }
 0x20e   :  { %2009 = vsyncpa [#allocation4 + $0x1], 1 }
 0x20f   :  { %2010 = vsyncpa [#allocation7], 1 }
 0x210   :  { %2012 = vsyncpa [#allocation7 + $0x1], 1 }
 0x211   :  { %2013 = vsyncpa [#allocation5], 1 }
 0x212   :  { %2015 = vsyncpa [#allocation5 + $0x1], 1 }

</bundles_post_ra>
